<compile_context>
chip_gen: v6e
topology: v6e:2x2x1
jax: 0.10.0
libtpu: 0.0.40
codegen_flags: <defaults>
</compile_context>

<pallas_src>
import jax
import jax.numpy as jnp
from jax import lax
from jax.experimental import pallas as pl
from jax.experimental.pallas import tpu as pltpu

# --- config (small, consistent with the module) ---
B = 2          # batch
N = 8          # sequence length (number of tokens)
D = 32         # n_embd
N_HEADS = 4
HEAD = D // N_HEADS
FF = 4 * D
EPS = 1e-3
SCALE = D ** (-0.5)   # module scales by n_embd**-0.5 (not head_size**-0.5)

assert HEAD & (HEAD - 1) == 0, "HEAD must be a power of two for the shift-based mask"
_LOG2_HEAD = HEAD.bit_length() - 1

# Packed weight-slab column offsets: [wq|wk|wv | wp | w1 | w2^T]
_QKV0, _QKV1 = 0, 3 * D                   #   0: 96
_WP0,  _WP1 = 3 * D, 4 * D                #  96:128
_W10,  _W11 = 4 * D, 4 * D + FF           # 128:256
_W20,  _W21 = 4 * D + FF, 4 * D + 2 * FF  # 256:384   (w2 stored transposed)
_WCOLS = _W21

# Explicit matmul settings: f32 accumulation + full-f32 multi-pass MXU math.
_MM = dict(preferred_element_type=jnp.float32, precision=lax.Precision.HIGHEST)


def _layer_norm(x, w, b):
    mu = jnp.mean(x, axis=-1, keepdims=True)
    var = jnp.mean((x - mu) ** 2, axis=-1, keepdims=True)
    return (x - mu) * lax.rsqrt(var + EPS) * w + b


def _gelu_exact(x):
    return 0.5 * x * (1.0 + lax.erf(x * (2.0 ** -0.5)))


def transformer_block_kernel(
    x_ref,      # (B*N, D)       flattened tokens
    w_ref,      # (D, 384)       [wq|wk|wv|wp|w1|w2^T] lane-concatenated
    vec_ref,    # (8, 128)       biases + LayerNorm vectors, packed by row
    o_ref,      # (B*N, D)
):
    x = x_ref[...]                                          # (B*N, D)

    # --- unpack the small-vector slab (static row/lane slices, zero DMAs) ---
    bqkv = vec_ref[0:1, 0:3 * D]          # bq|bk|bv     (1, 96)
    bp   = vec_ref[0:1, 3 * D:4 * D]      # proj bias    (1, 32)
    ln1w = vec_ref[1:2, 0:D]
    ln1b = vec_ref[1:2, D:2 * D]
    ln2w = vec_ref[1:2, 2 * D:3 * D]
    ln2b = vec_ref[1:2, 3 * D:4 * D]
    b1   = vec_ref[2:3, 0:FF]             # ff1 bias     (1, 128)
    b2   = vec_ref[3:4, 0:D]              # ff2 bias     (1, 32)

    # --- ln1 ---
    h = _layer_norm(x, ln1w, ln1b)                          # (B*N, D)

    # --- fused QKV: one matmul, then cheap static lane slices ---
    qkv = jnp.dot(h, w_ref[:, _QKV0:_QKV1], **_MM) + bqkv   # (B*N, 3D)
    q = qkv[:, 0:D].reshape(B, N, D)
    k = qkv[:, D:2 * D].reshape(B, N, D)
    v = qkv[:, 2 * D:3 * D].reshape(B, N, D)

    # --- block-diagonal per-head mask with the scale folded in (built on the
    #     VPU from iotas; hides under MXU latency) ---
    ri = lax.broadcasted_iota(jnp.int32, (D, D), 0) >> _LOG2_HEAD
    ci = lax.broadcasted_iota(jnp.int32, (D, D), 1) >> _LOG2_HEAD
    mask = jnp.where(ri == ci, jnp.float32(SCALE), jnp.float32(0.0))

    # --- "attention": the module multiplies the RAW scaled scores by v (its
    #     softmax is unused).  With no softmax the per-head math reassociates
    #     exactly:
    #        concat_h[(q_h k_h^T * scale) @ v_h]
    #          == q @ ((k^T @ v) ⊙ blockdiag_head_mask * scale)
    #     expressed here as two batched dot_generals (no transposes / concat).
    kv = lax.dot_general(k, v, (((1,), (1,)), ((0,), (0,))), **_MM)    # (B, D, D)
    kv = kv * mask[None, :, :]
    att = lax.dot_general(q, kv, (((2,), (1,)), ((0,), (0,))), **_MM)  # (B, N, D)
    att = att.reshape(B * N, D)

    att = jnp.dot(att, w_ref[:, _WP0:_WP1], **_MM) + bp
    # dropout(p) == identity in eval mode

    h = h + att                                             # residual on ln1(x)

    # --- ln2 + feed-forward ---
    h2 = _layer_norm(h, ln2w, ln2b)
    f = jnp.dot(h2, w_ref[:, _W10:_W11], **_MM) + b1        # (B*N, FF)
    f = _gelu_exact(f)
    # w2 is stored transposed inside the slab: contract the lane axes of both.
    f = lax.dot_general(f, w_ref[:, _W20:_W21],
                        (((1,), (1,)), ((), ())), **_MM) + b2
    # dropout == identity in eval mode

    o_ref[...] = h2 + f                                     # residual on ln2(...)


def pack_params(p):
    """One-time packing of the 16 module parameters into two VMEM slabs.

    w_slab  : (D, 384)  = [wq|wk|wv|wp|w1|w2^T]  (lane concatenation)
    vec_slab: (8, 128)  row 0 = bq|bk|bv|bp, row 1 = ln1w|ln1b|ln2w|ln2b,
                         row 2 = b1, row 3 = b2 (rest padding)
    """
    w_slab = jnp.concatenate(
        [p["wq"], p["wk"], p["wv"], p["wp"], p["w1"], p["w2"].T], axis=1)
    assert w_slab.shape == (D, _WCOLS)

    vec = jnp.zeros((8, 128), jnp.float32)
    vec = vec.at[0, 0:3 * D].set(
        jnp.concatenate([p["bq"][0], p["bk"][0], p["bv"][0]]))
    vec = vec.at[0, 3 * D:4 * D].set(p["bp"][0])
    vec = vec.at[1, 0:D].set(p["ln1w"][0])
    vec = vec.at[1, D:2 * D].set(p["ln1b"][0])
    vec = vec.at[1, 2 * D:3 * D].set(p["ln2w"][0])
    vec = vec.at[1, 3 * D:4 * D].set(p["ln2b"][0])
    vec = vec.at[2, 0:FF].set(p["b1"][0])
    vec = vec.at[3, 0:D].set(p["b2"][0])
    return w_slab, vec


def transformer_block(x, w_slab, vec_slab):
    """x: (B, N, D) float32.  w_slab/vec_slab: from pack_params()."""
    Bx, Nx, Dx = x.shape
    assert (Bx, Nx, Dx) == (B, N, D)
    x2 = x.reshape(Bx * Nx, Dx)                            # flatten (B, N) -> rows

    out2 = pl.pallas_call(
        transformer_block_kernel,
        out_shape=jax.ShapeDtypeStruct((Bx * Nx, Dx), jnp.float32),
        in_specs=[pl.BlockSpec(memory_space=pltpu.MemorySpace.VMEM)] * 3,
        out_specs=pl.BlockSpec(memory_space=pltpu.MemorySpace.VMEM),
    )(x2, w_slab, vec_slab)
    return out2.reshape(Bx, Nx, Dx)


def init_params(key):
    """Deterministic synthetic weights; shapes match the module __init__."""
    ks = jax.random.split(key, 8)

    def lin(k, fan_in, fan_out):
        # PyTorch Linear default init: U(-1/sqrt(fan_in), 1/sqrt(fan_in));
        # stored as (in, out) so the kernel does y = x @ W + b.
        bound = 1.0 / (fan_in ** 0.5)
        kw, kb = jax.random.split(k)
        w = jax.random.uniform(kw, (fan_in, fan_out), jnp.float32, -bound, bound)
        b = jax.random.uniform(kb, (1, fan_out), jnp.float32, -bound, bound)
        return w, b

    wq, bq = lin(ks[0], D, D)   # concat of N_HEADS Linear(D, HEAD) query layers
    wk, bk = lin(ks[1], D, D)
    wv, bv = lin(ks[2], D, D)
    wp, bp = lin(ks[3], D, D)   # output projection
    w1, b1 = lin(ks[4], D, FF)  # ffwd first linear
    w2, b2 = lin(ks[5], FF, D)  # ffwd second linear

    return dict(
        wq=wq, bq=bq, wk=wk, bk=bk, wv=wv, bv=bv,
        wp=wp, bp=bp,
        ln1w=jnp.ones((1, D), jnp.float32), ln1b=jnp.zeros((1, D), jnp.float32),
        ln2w=jnp.ones((1, D), jnp.float32), ln2b=jnp.zeros((1, D), jnp.float32),
        w1=w1, b1=b1, w2=w2, b2=b2,
    )


def reference(x, p):
    """Pure-JAX reference matching the PyTorch forward (eval mode), written in
    the same per-head order as the PyTorch module."""
    h = _layer_norm(x, p["ln1w"][0], p["ln1b"][0])
    q = h @ p["wq"] + p["bq"][0]
    k = h @ p["wk"] + p["bk"][0]
    v = h @ p["wv"] + p["bv"][0]
    outs = []
    for hh in range(N_HEADS):
        sl = slice(hh * HEAD, (hh + 1) * HEAD)
        wei = jnp.einsum("bnd,bmd->bnm", q[..., sl], k[..., sl]) * SCALE
        # softmax(wei) is computed in the PyTorch code but unused for the output.
        outs.append(jnp.einsum("bnm,bmd->bnd", wei, v[..., sl]))
    att = jnp.concatenate(outs, axis=-1) @ p["wp"] + p["bp"][0]
    h = h + att
    h2 = _layer_norm(h, p["ln2w"][0], p["ln2b"][0])
    f = _gelu_exact(h2 @ p["w1"] + p["b1"][0]) @ p["w2"] + p["b2"][0]
    return h2 + f


if __name__ == "__main__":
    key = jax.random.PRNGKey(0)
    kx, kp = jax.random.split(key)
    x = jax.random.normal(kx, (B, N, D), jnp.float32)
    params = init_params(kp)
    w_slab, vec_slab = pack_params(params)   # one-time parameter preparation

    out = transformer_block(x, w_slab, vec_slab)
    out = jax.block_until_ready(out)

    ref = reference(x, params)
    assert out.shape == (B, N, D)
    # Tolerance covers the mathematically-exact but reassociated attention
    # (kernel: q @ ((k^T v) ⊙ mask); reference: per-head (q k^T) v) plus the
    # default-precision MXU rounding in the pure-JAX reference (the kernel's
    # own matmuls run at Precision.HIGHEST).
    assert jnp.allclose(out, ref, atol=3e-3, rtol=3e-3), (
        float(jnp.max(jnp.abs(out - ref))))

    print("KERNEL_OK")
</pallas_src>

<mosaic_0001>
module attributes {stable_mosaic.version = 11 : i64} {
  func.func @transformer_block_kernel(%arg0: memref<16x32xf32, #tpu.memory_space<vmem>>, %arg1: memref<32x384xf32, #tpu.memory_space<vmem>>, %arg2: memref<8x128xf32, #tpu.memory_space<vmem>>, %arg3: memref<16x32xf32, #tpu.memory_space<vmem>>) attributes {dimension_semantics = [], scalar_prefetch = 0 : i64, scratch_operands = 0 : i64, tpu.core_type = #tpu.core_type<tc>} {
    %c0 = arith.constant 0 : index
    %c0_0 = arith.constant 0 : index
    %0 = vector.load %arg0[%c0, %c0_0] : memref<16x32xf32, #tpu.memory_space<vmem>>, vector<16x32xf32>
    %c0_1 = arith.constant 0 : index
    %c0_2 = arith.constant 0 : index
    %1 = vector.load %arg2[%c0_1, %c0_2] : memref<8x128xf32, #tpu.memory_space<vmem>>, vector<1x96xf32>
    %c0_3 = arith.constant 0 : index
    %c96 = arith.constant 96 : index
    %2 = vector.load %arg2[%c0_3, %c96] : memref<8x128xf32, #tpu.memory_space<vmem>>, vector<1x32xf32>
    %c1 = arith.constant 1 : index
    %c0_4 = arith.constant 0 : index
    %3 = vector.load %arg2[%c1, %c0_4] : memref<8x128xf32, #tpu.memory_space<vmem>>, vector<1x32xf32>
    %c1_5 = arith.constant 1 : index
    %c32 = arith.constant 32 : index
    %4 = vector.load %arg2[%c1_5, %c32] : memref<8x128xf32, #tpu.memory_space<vmem>>, vector<1x32xf32>
    %c1_6 = arith.constant 1 : index
    %c64 = arith.constant 64 : index
    %5 = vector.load %arg2[%c1_6, %c64] : memref<8x128xf32, #tpu.memory_space<vmem>>, vector<1x32xf32>
    %c1_7 = arith.constant 1 : index
    %c96_8 = arith.constant 96 : index
    %6 = vector.load %arg2[%c1_7, %c96_8] : memref<8x128xf32, #tpu.memory_space<vmem>>, vector<1x32xf32>
    %c2 = arith.constant 2 : index
    %c0_9 = arith.constant 0 : index
    %7 = vector.load %arg2[%c2, %c0_9] : memref<8x128xf32, #tpu.memory_space<vmem>>, vector<1x128xf32>
    %c3 = arith.constant 3 : index
    %c0_10 = arith.constant 0 : index
    %8 = vector.load %arg2[%c3, %c0_10] : memref<8x128xf32, #tpu.memory_space<vmem>>, vector<1x32xf32>
    %cst = arith.constant dense<0.000000e+00> : vector<16xf32>
    %9 = vector.multi_reduction <add>, %0, %cst [1] : vector<16x32xf32> to vector<16xf32>
    %10 = vector.shape_cast %9 : vector<16xf32> to vector<16x1xf32>
    %cst_11 = arith.constant 3.200000e+01 : f32
    %11 = vector.broadcast %cst_11 : f32 to vector<16x1xf32>
    %12 = arith.divf %10, %11 : vector<16x1xf32>
    %13 = vector.broadcast %12 : vector<16x1xf32> to vector<16x32xf32>
    %14 = arith.subf %0, %13 : vector<16x32xf32>
    %15 = arith.mulf %14, %14 : vector<16x32xf32>
    %cst_12 = arith.constant dense<0.000000e+00> : vector<16xf32>
    %16 = vector.multi_reduction <add>, %15, %cst_12 [1] : vector<16x32xf32> to vector<16xf32>
    %17 = vector.shape_cast %16 : vector<16xf32> to vector<16x1xf32>
    %cst_13 = arith.constant 3.200000e+01 : f32
    %18 = vector.broadcast %cst_13 : f32 to vector<16x1xf32>
    %19 = arith.divf %17, %18 : vector<16x1xf32>
    %20 = vector.broadcast %12 : vector<16x1xf32> to vector<16x32xf32>
    %21 = arith.subf %0, %20 : vector<16x32xf32>
    %cst_14 = arith.constant 1.000000e-03 : f32
    %22 = vector.broadcast %cst_14 : f32 to vector<16x1xf32>
    %23 = arith.addf %19, %22 : vector<16x1xf32>
    %24 = math.rsqrt %23 : vector<16x1xf32>
    %25 = vector.broadcast %24 : vector<16x1xf32> to vector<16x32xf32>
    %26 = arith.mulf %21, %25 : vector<16x32xf32>
    %27 = vector.broadcast %3 : vector<1x32xf32> to vector<16x32xf32>
    %28 = arith.mulf %26, %27 : vector<16x32xf32>
    %29 = vector.broadcast %4 : vector<1x32xf32> to vector<16x32xf32>
    %30 = arith.addf %28, %29 : vector<16x32xf32>
    %c0_15 = arith.constant 0 : index
    %c0_16 = arith.constant 0 : index
    %31 = vector.load %arg1[%c0_15, %c0_16] : memref<32x384xf32, #tpu.memory_space<vmem>>, vector<32x96xf32>
    %cst_17 = arith.constant dense<0.000000e+00> : vector<16x96xf32>
    %32 = tpu.matmul %30, %31, %cst_17 {dimension_numbers = #tpu.dot_dimension_numbers<[1], [0], [0], [1], [0, 0, 1, 1], [], []>, precision = #tpu.contract_precision<fp32>} : vector<16x32xf32>, vector<32x96xf32>, vector<16x96xf32> -> vector<16x96xf32>
    %33 = vector.broadcast %1 : vector<1x96xf32> to vector<16x96xf32>
    %34 = arith.addf %32, %33 : vector<16x96xf32>
    %35 = vector.extract_strided_slice %34 {offsets = [0, 0], sizes = [16, 32], strides = [1, 1]} : vector<16x96xf32> to vector<16x32xf32>
    %36 = vector.shape_cast %35 : vector<16x32xf32> to vector<2x8x32xf32>
    %37 = vector.extract_strided_slice %34 {offsets = [0, 32], sizes = [16, 32], strides = [1, 1]} : vector<16x96xf32> to vector<16x32xf32>
    %38 = vector.shape_cast %37 : vector<16x32xf32> to vector<2x8x32xf32>
    %39 = vector.extract_strided_slice %34 {offsets = [0, 64], sizes = [16, 32], strides = [1, 1]} : vector<16x96xf32> to vector<16x32xf32>
    %40 = vector.shape_cast %39 : vector<16x32xf32> to vector<2x8x32xf32>
    %41 = tpu.iota {dimensions = array<i32: 0>} : vector<32x32xi32>
    %c3_i32 = arith.constant 3 : i32
    %42 = vector.broadcast %c3_i32 : i32 to vector<32x32xi32>
    %43 = arith.shrsi %41, %42 : vector<32x32xi32>
    %44 = tpu.iota {dimensions = array<i32: 1>} : vector<32x32xi32>
    %c3_i32_18 = arith.constant 3 : i32
    %45 = vector.broadcast %c3_i32_18 : i32 to vector<32x32xi32>
    %46 = arith.shrsi %44, %45 : vector<32x32xi32>
    %47 = arith.cmpi eq, %43, %46 : vector<32x32xi32>
    %cst_19 = arith.constant 0.176776692 : f32
    %cst_20 = arith.constant 0.000000e+00 : f32
    %48 = vector.broadcast %cst_19 : f32 to vector<32x32xf32>
    %49 = vector.broadcast %cst_20 : f32 to vector<32x32xf32>
    %50 = arith.select %47, %48, %49 : vector<32x32xi1>, vector<32x32xf32>
    %cst_21 = arith.constant dense<0.000000e+00> : vector<2x32x32xf32>
    %51 = tpu.matmul %38, %40, %cst_21 {dimension_numbers = #tpu.dot_dimension_numbers<[1], [1], [2], [2], [0, 0, 0, 2, 1, 2], [0], [0]>, precision = #tpu.contract_precision<fp32>} : vector<2x8x32xf32>, vector<2x8x32xf32>, vector<2x32x32xf32> -> vector<2x32x32xf32>
    %52 = vector.shape_cast %50 : vector<32x32xf32> to vector<1x32x32xf32>
    %53 = vector.broadcast %52 : vector<1x32x32xf32> to vector<2x32x32xf32>
    %54 = arith.mulf %51, %53 : vector<2x32x32xf32>
    %cst_22 = arith.constant dense<0.000000e+00> : vector<2x8x32xf32>
    %55 = tpu.matmul %36, %54, %cst_22 {dimension_numbers = #tpu.dot_dimension_numbers<[2], [1], [1], [2], [0, 0, 0, 1, 1, 2], [0], [0]>, precision = #tpu.contract_precision<fp32>} : vector<2x8x32xf32>, vector<2x32x32xf32>, vector<2x8x32xf32> -> vector<2x8x32xf32>
    %56 = vector.shape_cast %55 : vector<2x8x32xf32> to vector<16x32xf32>
    %c0_23 = arith.constant 0 : index
    %c96_24 = arith.constant 96 : index
    %57 = vector.load %arg1[%c0_23, %c96_24] : memref<32x384xf32, #tpu.memory_space<vmem>>, vector<32x32xf32>
    %cst_25 = arith.constant dense<0.000000e+00> : vector<16x32xf32>
    %58 = tpu.matmul %56, %57, %cst_25 {dimension_numbers = #tpu.dot_dimension_numbers<[1], [0], [0], [1], [0, 0, 1, 1], [], []>, precision = #tpu.contract_precision<fp32>} : vector<16x32xf32>, vector<32x32xf32>, vector<16x32xf32> -> vector<16x32xf32>
    %59 = vector.broadcast %2 : vector<1x32xf32> to vector<16x32xf32>
    %60 = arith.addf %58, %59 : vector<16x32xf32>
    %61 = arith.addf %30, %60 : vector<16x32xf32>
    %cst_26 = arith.constant dense<0.000000e+00> : vector<16xf32>
    %62 = vector.multi_reduction <add>, %61, %cst_26 [1] : vector<16x32xf32> to vector<16xf32>
    %63 = vector.shape_cast %62 : vector<16xf32> to vector<16x1xf32>
    %cst_27 = arith.constant 3.200000e+01 : f32
    %64 = vector.broadcast %cst_27 : f32 to vector<16x1xf32>
    %65 = arith.divf %63, %64 : vector<16x1xf32>
    %66 = vector.broadcast %65 : vector<16x1xf32> to vector<16x32xf32>
    %67 = arith.subf %61, %66 : vector<16x32xf32>
    %68 = arith.mulf %67, %67 : vector<16x32xf32>
    %cst_28 = arith.constant dense<0.000000e+00> : vector<16xf32>
    %69 = vector.multi_reduction <add>, %68, %cst_28 [1] : vector<16x32xf32> to vector<16xf32>
    %70 = vector.shape_cast %69 : vector<16xf32> to vector<16x1xf32>
    %cst_29 = arith.constant 3.200000e+01 : f32
    %71 = vector.broadcast %cst_29 : f32 to vector<16x1xf32>
    %72 = arith.divf %70, %71 : vector<16x1xf32>
    %73 = vector.broadcast %65 : vector<16x1xf32> to vector<16x32xf32>
    %74 = arith.subf %61, %73 : vector<16x32xf32>
    %cst_30 = arith.constant 1.000000e-03 : f32
    %75 = vector.broadcast %cst_30 : f32 to vector<16x1xf32>
    %76 = arith.addf %72, %75 : vector<16x1xf32>
    %77 = math.rsqrt %76 : vector<16x1xf32>
    %78 = vector.broadcast %77 : vector<16x1xf32> to vector<16x32xf32>
    %79 = arith.mulf %74, %78 : vector<16x32xf32>
    %80 = vector.broadcast %5 : vector<1x32xf32> to vector<16x32xf32>
    %81 = arith.mulf %79, %80 : vector<16x32xf32>
    %82 = vector.broadcast %6 : vector<1x32xf32> to vector<16x32xf32>
    %83 = arith.addf %81, %82 : vector<16x32xf32>
    %c0_31 = arith.constant 0 : index
    %c128 = arith.constant 128 : index
    %84 = vector.load %arg1[%c0_31, %c128] : memref<32x384xf32, #tpu.memory_space<vmem>>, vector<32x128xf32>
    %cst_32 = arith.constant dense<0.000000e+00> : vector<16x128xf32>
    %85 = tpu.matmul %83, %84, %cst_32 {dimension_numbers = #tpu.dot_dimension_numbers<[1], [0], [0], [1], [0, 0, 1, 1], [], []>, precision = #tpu.contract_precision<fp32>} : vector<16x32xf32>, vector<32x128xf32>, vector<16x128xf32> -> vector<16x128xf32>
    %86 = vector.broadcast %7 : vector<1x128xf32> to vector<16x128xf32>
    %87 = arith.addf %85, %86 : vector<16x128xf32>
    %cst_33 = arith.constant 5.000000e-01 : f32
    %88 = vector.broadcast %cst_33 : f32 to vector<16x128xf32>
    %89 = arith.mulf %88, %87 : vector<16x128xf32>
    %cst_34 = arith.constant 0.707106769 : f32
    %90 = vector.broadcast %cst_34 : f32 to vector<16x128xf32>
    %91 = arith.mulf %87, %90 : vector<16x128xf32>
    %92 = math.erf %91 : vector<16x128xf32>
    %cst_35 = arith.constant 1.000000e+00 : f32
    %93 = vector.broadcast %cst_35 : f32 to vector<16x128xf32>
    %94 = arith.addf %93, %92 : vector<16x128xf32>
    %95 = arith.mulf %89, %94 : vector<16x128xf32>
    %c0_36 = arith.constant 0 : index
    %c256 = arith.constant 256 : index
    %96 = vector.load %arg1[%c0_36, %c256] : memref<32x384xf32, #tpu.memory_space<vmem>>, vector<32x128xf32>
    %cst_37 = arith.constant dense<0.000000e+00> : vector<16x32xf32>
    %97 = tpu.matmul %95, %96, %cst_37 {dimension_numbers = #tpu.dot_dimension_numbers<[1], [1], [0], [0], [0, 0, 1, 0], [], []>, precision = #tpu.contract_precision<fp32>} : vector<16x128xf32>, vector<32x128xf32>, vector<16x32xf32> -> vector<16x32xf32>
    %98 = vector.broadcast %8 : vector<1x32xf32> to vector<16x32xf32>
    %99 = arith.addf %97, %98 : vector<16x32xf32>
    %100 = arith.addf %83, %99 : vector<16x32xf32>
    %c0_38 = arith.constant 0 : index
    %c0_39 = arith.constant 0 : index
    %101 = vector.load %arg3[%c0_38, %c0_39] : memref<16x32xf32, #tpu.memory_space<vmem>>, vector<16x32xf32>
    tpu.vector_store %arg3[%c0_38, %c0_39], %100 {strides = array<i32>} : memref<16x32xf32, #tpu.memory_space<vmem>>, vector<16x32xf32>,
    return
  }
}

</mosaic_0001>

<bundles_post_ra>
// kernel: tpu_custom_call.1
= control target key start
LH: loop header
LB: loop body
LE: loop exit
PB: predicated region body
PF: predicated region fallthrough
CT: control target
= control target key end

     0   :  { %8 = vsyncpa [#allocation3], 0  ;;  %s6225_s0 = inlined_call_operand.hbm [shape: f32[16,32], index: 0, kind: input, shape index: {}]   ;;  %s6226_s1 = inlined_call_operand.hbm [shape: f32[32,384], index: 1, kind: input, shape index: {}]   ;;  %s6227_s2 = inlined_call_operand.hbm [shape: f32[8,128], index: 2, kind: input, shape index: {}]   ;;  %s6228_s3 = inlined_call_operand.hbm [shape: f32[16,32], index: 3, kind: output, shape index: {}]  }
   0x1   :  { %9 = vsyncpa [#allocation6], 0 }
   0x2   :  { %10 = vsyncpa [#allocation4], 0  ;;  %s5471_s12 = smov [#allocation5]  }
   0x3   :  { %s28_s13 = sshll.u32 %s5471_s12, 4  ;;  %s29_s13 = int_to_ptr.vmem [resolvable:$true] %s28_s13 }
   0x4   :  { %s5393_s14 = scalar_lea.vmem %s29_s13, 1536  ;;  %p5398_p1 = scmp.lt.s32.totalorder %s29_s13, %s29_s13 }
   0x5   :  { %p5394_p0 = scmp.ne.s32.totalorder %s29_s13, %s5393_s14  ;;  %p5399_p2 = scmp.lt.s32.totalorder %s5393_s14, %s5393_s14 }
   0x7   :  { %p5400_p3 = por %p5399_p2, %p5398_p1 }
   0x9   :  { %p5401_p4 = pnand %p5400_p3, %p5394_p0 }
   0xb   :  { %5404 = shalt.err (!%p5401_p4)
}
   0xc   :  { %s5472_s15 = smov 384   ;;  %s5473_s16 = smov 24  }
   0xd   :  { %34 = dma.hbm_to_vmem [thread:$0]  %s6226_s1, 1536, %s29_s13, [#allocation6], %s5472_s15, %s5472_s15, %s5473_s16  }
   0xe   :  { %s5474_s19 = smov [#allocation2]  }
   0xf   :  { %s16_s20 = sshll.u32 %s5474_s19, 4  ;;  %s17_s20 = int_to_ptr.vmem [resolvable:$true] %s16_s20 }
  0x10   :  { %s5413_s21 = scalar_lea.vmem %s17_s20, 256  ;;  %p5418_p6 = scmp.lt.s32.totalorder %s17_s20, %s17_s20 }
  0x11   :  { %p5414_p5 = scmp.ne.s32.totalorder %s17_s20, %s5413_s21  ;;  %p5419_p7 = scmp.lt.s32.totalorder %s5413_s21, %s5413_s21 }
  0x13   :  { %p5420_p8 = por %p5419_p7, %p5418_p6 }
  0x15   :  { %p5421_p9 = pnand %p5420_p8, %p5414_p5 }
  0x17   :  { %5424 = shalt.err (!%p5421_p9)
}
  0x18   :  { %s5475_s22 = smov 128   ;;  %s5476_s23 = smov 8  }
  0x19   :  { %22 = dma.hbm_to_vmem [thread:$0]  %s6225_s0, 256, %s17_s20, [#allocation3], %s5475_s22, %s5475_s22, %s5476_s23  }
  0x1a   :  { %s5477_s1 = smov [#allocation7]  }
  0x1b   :  { %s41_s26 = sshll.u32 %s5477_s1, 4  ;;  %s42_s26 = int_to_ptr.vmem [resolvable:$true] %s41_s26 }
  0x1c   :  { %s5433_s27 = scalar_lea.vmem %s42_s26, 128  ;;  %p5438_p11 = scmp.lt.s32.totalorder %s42_s26, %s42_s26 }
  0x1d   :  { %p5434_p10 = scmp.ne.s32.totalorder %s42_s26, %s5433_s27  ;;  %p5439_p12 = scmp.lt.s32.totalorder %s5433_s27, %s5433_s27 }
  0x1f   :  { %p5440_p13 = por %p5439_p12, %p5438_p11 }
  0x21   :  { %p5441_p0 = pnand %p5440_p13, %p5434_p10 }
  0x23   :  { %5444 = shalt.err (!%p5441_p0)
}
  0x24   :  { %44 = dma.hbm_to_vmem [thread:$0]  %s6227_s2, 128, %s42_s26, [#allocation6]  }
  0x25   :  { %5465 = dma.done.wait [#allocation3], 256  }
  0x26   :  { %5466 = vsyncadd [#allocation3], 4294967040 }
  0x27   :  { %5467 = dma.done.wait [#allocation6], 1664  }
  0x28   :  { %5468 = vsyncadd [#allocation6], 4294965632  ;;  %vm60_vm0 = vcmask 261120   ;;  %v54_v0 = vld [vmem:[#allocation2] sm:$0xff]  ;;  %v55_v1 = vld [vmem:[#allocation2 + $0x8] sm:$0xff]  ;;  %s5478_s0 = smov 96  }
  0x29   :  { %v61_v2 = vsel %vm60_vm0, %v54_v0, 0.0  ;;  %v64_v3 = vsel %vm60_vm0, %v55_v1, 0.0  ;;  %v5518_v4 = vld [vmem:[#allocation7 + $0x1] ss:$0 sm:$0xff]  ;;  %v5524_v15 = vld [vmem:[#allocation5 + $0x48] sm:$0xff]  ;;  %v5529_v17 = vld [vmem:[#allocation5 + $0x30] sm:$0xff] }
  0x2a   :  { %62 = vadd.xlane.f32.xlu0 %v61_v2  ;;  %v5527_v16 = vand.u32 4294901760, %v5524_v15  ;;  %v5536_v19 = vand.u32 4294901760, %v5529_v17  ;;  %v5539_v20 = vld [vmem:[#allocation5 + $0x18] sm:$0xff]  ;;  %v5553_v24 = vld [vmem:[#allocation5] sm:$0xff]  ;;  %s5479_s2 = smov 64   ;;  %vm701_vm1 = vcmask 64512  }
  0x2b   :  { %v5550_v23 = vand.u32 4294901760, %v5539_v20  ;;  %v5566_v28 = vand.u32 4294901760, %v5553_v24  ;;  %vm5481_vm2 = vmmov 0   ;;  %s5482_s30 = smov 32   ;;  %s5483_s4 = smov [#allocation8]  }
  0x2c   :  { %v5533_v18 = vsub.f32 %v5524_v15, %v5527_v16  ;;  %4867 = vmatprep.subr.mxu0 %v5527_v16  ;;  %v5547_v22 = vsub.f32 %v5529_v17, %v5536_v19  ;;  %s4586_s5 = sshll.u32 %s5483_s4, 4  ;;  %s4587_s5 = int_to_ptr.vmem [resolvable:$true] %s4586_s5 }
  0x2d   :  { %4868 = vmatpush3.msra.mxu0 %v5527_v16  ;;  %v5563_v27 = vsub.f32 %v5539_v20, %v5550_v23  ;;  %v5577_v32 = vsub.f32 %v5553_v24, %v5566_v28  ;;  %s5445_s6 = scalar_lea.vmem %s4587_s5, 256  ;;  %p5450_p2 = scmp.lt.s32.totalorder %s4587_s5, %s4587_s5 }
  0x2e   :  { %65 = vadd.xlane.f32.xlu0 %v64_v3  ;;  %v5543_v21 = vand.u32 4294901760, %v5533_v18  ;;  %4869 = vmatprep.subr.mxu0 %v5536_v19  ;;  %v5559_v26 = vand.u32 4294901760, %v5547_v22  ;;  %p5446_p1 = scmp.ne.s32.totalorder %s4587_s5, %s5445_s6  ;;  %p5451_p3 = scmp.lt.s32.totalorder %s5445_s6, %s5445_s6 }
  0x2f   :  { %4870 = vmatpush3.msra.mxu0 %v5536_v19  ;;  %v5573_v31 = vand.u32 4294901760, %v5563_v27  ;;  %v5584_v35 = vand.u32 4294901760, %v5577_v32 }
  0x30   :  { %v231_v25 = vsub.f32 %v5533_v18, %v5543_v21  ;;  %4871 = vmatprep.subr.mxu0 %v5550_v23  ;;  %v238_v30 = vsub.f32 %v5547_v22, %v5559_v26  ;;  %p5452_p4 = por %p5451_p3, %p5450_p2 }
  0x31   :  { %4872 = vmatpush3.msra.mxu0 %v5550_v23  ;;  %v245_v34 = vsub.f32 %v5563_v27, %v5573_v31  ;;  %v252_v37 = vsub.f32 %v5577_v32, %v5584_v35 }
  0x32   :  { %v232_v29 = vand.u32 4294901760, %v231_v25  ;;  %4873 = vmatprep.subr.mxu0 %v5566_v28  ;;  %v239_v33 = vand.u32 4294901760, %v238_v30  ;;  %p5453_p5 = pnand %p5452_p4, %p5446_p1 }
  0x33   :  { %4874 = vmatpush3.msra.mxu0 %v5566_v28  ;;  %v246_v36 = vand.u32 4294901760, %v245_v34  ;;  %v253_v38 = vand.u32 4294901760, %v252_v37 }
  0x34   :  { %4878 = vmatprep.subr.mxu1 %v232_v29  ;;  %4889 = vmatprep.subr.mxu0 %v5533_v18 }
  0x35   :  { %4879 = vmatpush3.msra.mxu1 %v232_v29 }
  0x36   :  { %4880 = vmatprep.subr.mxu1 %v239_v33 }
  0x37   :  { %4881 = vmatpush3.msra.mxu1 %v239_v33 }
  0x38   :  { %4882 = vmatprep.subr.mxu1 %v246_v36 }
  0x39   :  { %4883 = vmatpush3.msra.mxu1 %v246_v36 }
  0x3a   :  { %4884 = vmatprep.subr.mxu1 %v253_v38 }
  0x3b   :  { %4885 = vmatpush3.msra.mxu1 %v253_v38 }
  0x3c   :  { %4900 = vmatprep.subr.mxu1 %v5527_v16 }
  0x44   :  { %95 = vrot.lane.b32.xlu0 %v5518_v4, %s5478_s0 }
  0xb3   :  { %v63_v5 = vpop.xlane.xlu0 %62 }
  0xb4   :  { %v68_v6 = vmul.f32 0.03125, %v63_v5  ;;  %v5630_v5 = vld [vmem:[#allocation7] ss:$0 sm:$0xff] }
  0xb6   :  { %v70_v7 = vsub.f32 %v54_v0, %v68_v6 }
  0xb7   :  { %v66_v8 = vpop.xlane.xlu0 %65 }
  0xb8   :  { %v69_v9 = vmul.f32 0.03125, %v66_v8  ;;  %v72_v10 = vmul.f32 %v70_v7, %v70_v7 }
  0xba   :  { %v71_v11 = vsub.f32 %v55_v1, %v69_v9  ;;  %v74_v12 = vsel %vm60_vm0, %v72_v10, 0.0 }
  0xbb   :  { %75 = vadd.xlane.f32.xlu1 %v74_v12  ;;  %v96_v47 = vpop.permute.xlu0 %95 }
  0xbc   :  { %v73_v13 = vmul.f32 %v71_v11, %v71_v11 }
  0xbe   :  { %v77_v14 = vsel %vm60_vm0, %v73_v13, 0.0 }
  0xbf   :  { %78 = vadd.xlane.f32.xlu1 %v77_v14 }
 0x144   :  { %v76_v39 = vpop.xlane.xlu1 %75 }
 0x145   :  { %v80_v40 = vmul.f32 0.03125, %v76_v39 }
 0x147   :  { %v82_v41 = vadd.f32 0.001, %v80_v40 }
 0x148   :  { %v79_v42 = vpop.xlane.xlu1 %78 }
 0x149   :  { %5372 = vrsqrt.f32 %v82_v41  ;;  %v81_v43 = vmul.f32 0.03125, %v79_v42 }
 0x14b   :  { %v83_v44 = vadd.f32 0.001, %v81_v43 }
 0x14d   :  { %5374 = vrsqrt.f32 %v83_v44 }
 0x156   :  { %v5373_v45 = vpop.eup %5372 }
 0x157   :  { %v86_v46 = vmul.f32 %v5373_v45, %v70_v7 }
 0x159   :  { %v92_v48 = vmul.f32 %v5518_v4, %v86_v46 }
 0x15a   :  { %v5375_v49 = vpop.eup %5374 }
 0x15b   :  { %v87_v50 = vmul.f32 %v5375_v49, %v71_v11  ;;  %v5591_v51 = vadd.f32 %v96_v47, %v92_v48 }
 0x15d   :  { %v93_v52 = vmul.f32 %v5518_v4, %v87_v50  ;;  %v109_v53 = vsel %vm60_vm0, %v5591_v51, 0 }
 0x15e   :  { %v183_v54 = vand.u32 4294901760, %v109_v53 }
 0x15f   :  { %v5596_v55 = vadd.f32 %v96_v47, %v93_v52 }
 0x160   :  { %v184_v56 = vsub.f32 %v109_v53, %v183_v54  ;;  %4886 = vmatprep.mubr.f32.mxu1 %v183_v54 }
 0x161   :  { %v112_v57 = vsel %vm60_vm0, %v5596_v55, 0 }
 0x162   :  { %v193_v58 = vand.u32 4294901760, %v112_v57  ;;  %v185_v59 = vand.u32 4294901760, %v184_v56 }
 0x164   :  { %v194_v60 = vsub.f32 %v112_v57, %v193_v58  ;;  %4887 = vmatmul.mubr.f32.vlgmr.msra.gmra.mxu1 %v193_v58  ;;  %v186_v61 = vsub.f32 %v184_v56, %v185_v59 }
 0x165   :  { %4901 = vmatpush3.msra.mxu1 %v5527_v16  ;;  %4908 = vmatprep.mubr.f32.mxu1 %v185_v59 }
 0x166   :  { %4902 = vmatprep.subr.mxu1 %v5536_v19  ;;  %v187_v62 = vand.u32 4294901760, %v186_v61  ;;  %v195_v63 = vand.u32 4294901760, %v194_v60 }
 0x167   :  { %4903 = vmatpush3.msra.mxu1 %v5536_v19 }
 0x168   :  { %4904 = vmatprep.subr.mxu1 %v5550_v23  ;;  %4875 = vmatprep.mubr.f32.mxu0 %v187_v62  ;;  %v196_v0 = vsub.f32 %v194_v60, %v195_v63 }
 0x169   :  { %4905 = vmatpush3.msra.mxu1 %v5550_v23 }
 0x16a   :  { %4906 = vmatprep.subr.mxu1 %v5566_v28  ;;  %v197_v1 = vand.u32 4294901760, %v196_v0 }
 0x16b   :  { %4907 = vmatpush3.msra.mxu1 %v5566_v28 }
 0x16c   :  { %4909 = vmatmul.mubr.f32.vlgmr.msra.gmra.mxu1 %v195_v63  ;;  %4922 = vmatprep.subr.mxu1 %v5527_v16 }
 0x16d   :  { %4876 = vmatmul.mubr.f32.vlgmr.msra.gmra.mxu0 %v197_v1  ;;  %4923 = vmatpush3.msra.mxu1 %v5527_v16 }
 0x16e   :  { %4890 = vmatpush3.msra.mxu0 %v5533_v18  ;;  %4930 = vmatprep.mubr.f32.mxu1 %v183_v54 }
 0x16f   :  { %4891 = vmatprep.subr.mxu0 %v5547_v22  ;;  %4897 = vmatprep.mubr.f32.mxu0 %v184_v56 }
 0x170   :  { %4924 = vmatprep.subr.mxu1 %v5536_v19  ;;  %4892 = vmatpush3.msra.mxu0 %v5547_v22 }
 0x171   :  { %4925 = vmatpush3.msra.mxu1 %v5536_v19  ;;  %4893 = vmatprep.subr.mxu0 %v5563_v27 }
 0x172   :  { %4926 = vmatprep.subr.mxu1 %v5550_v23  ;;  %4894 = vmatpush3.msra.mxu0 %v5563_v27 }
 0x173   :  { %4927 = vmatpush3.msra.mxu1 %v5550_v23  ;;  %4895 = vmatprep.subr.mxu0 %v5577_v32 }
 0x174   :  { %4928 = vmatprep.subr.mxu1 %v5566_v28  ;;  %4896 = vmatpush3.msra.mxu0 %v5577_v32 }
 0x175   :  { %4929 = vmatpush3.msra.mxu1 %v5566_v28  ;;  %4898 = vmatmul.mubr.f32.vlgmr.msra.gmra.mxu0 %v194_v60 }
 0x176   :  { %4911 = vmatprep.subr.mxu0 %v5543_v21  ;;  %4931 = vmatmul.mubr.f32.vlgmr.msra.gmra.mxu1 %v193_v58 }
 0x177   :  { %4912 = vmatpush3.msra.mxu0 %v5543_v21  ;;  %4919 = vmatprep.mubr.f32.mxu0 %v183_v54 }
 0x178   :  { %4913 = vmatprep.subr.mxu0 %v5559_v26 }
 0x179   :  { %4914 = vmatpush3.msra.mxu0 %v5559_v26 }
 0x17a   :  { %4915 = vmatprep.subr.mxu0 %v5573_v31 }
 0x17b   :  { %4916 = vmatpush3.msra.mxu0 %v5573_v31 }
 0x17c   :  { %4917 = vmatprep.subr.mxu0 %v5584_v35 }
 0x17d   :  { %4918 = vmatpush3.msra.mxu0 %v5584_v35 }
 0x17e   :  { %4920 = vmatmul.mubr.f32.vlgmr.msra.gmra.mxu0 %v193_v58 }
 0x224   :  { %v4888_v3 = vpop.f32.mrf.mxu1 }
 0x226   :  { %v290_v8 = vpop.f32.mrf.mxu1 }
 0x22c   :  { %v4910_v10 = vpop.f32.mrf.mxu1 }
 0x22d   :  { %v4877_v2 = vpop.f32.mrf.mxu0 }
 0x22e   :  { %v200_v9 = vadd.f32 %v4877_v2, %v5630_v5  ;;  %v460_v16 = vpop.f32.mrf.mxu1 }
 0x22f   :  { %v189_v4 = vpop.f32.mrf.mxu0 }
 0x230   :  { %v190_v6 = vadd.f32 %v5630_v5, %v189_v4  ;;  %v297_v13 = vadd.f32 %v4888_v3, %v200_v9 }
 0x232   :  { %v291_v12 = vadd.f32 %v290_v8, %v190_v6 }
 0x235   :  { %v4899_v7 = vpop.f32.mrf.mxu0 }
 0x236   :  { %v384_v18 = vadd.f32 %v4899_v7, %v297_v13  ;;  %v4932_v19 = vpop.f32.mrf.mxu1 }
 0x237   :  { %v376_v11 = vpop.f32.mrf.mxu0 }
 0x238   :  { %v377_v14 = vadd.f32 %v376_v11, %v291_v12  ;;  %v469_v25 = vadd.f32 %v4910_v10, %v384_v18  ;;  %v632_v27 = vpop.f32.mrf.mxu1 }
 0x23a   :  { %v461_v22 = vadd.f32 %v460_v16, %v377_v14 }
 0x23e   :  { %v4921_v21 = vpop.f32.mrf.mxu0 }
 0x23f   :  { %v558_v28 = vadd.f32 %v4921_v21, %v469_v25 }
 0x240   :  { %v551_v23 = vpop.f32.mrf.mxu0 }
 0x241   :  { %v552_v26 = vadd.f32 %v551_v23, %v461_v22  ;;  %v5638_v30 = vadd.f32 %v4932_v19, %v558_v28 }
 0x243   :  { %v5634_v29 = vadd.f32 %v632_v27, %v552_v26 }
 0x245   :  { %663 = vrot.lane.b32.xlu1 %v5634_v29, %s5478_s0 }
 0x249   :  { %1290 = vrot.lane.b32.xlu1 %v5638_v30, %s5478_s0 }
 0x24d   :  { %698 = vrot.lane.b32.xlu1 %v5634_v29, %s5479_s2 }
 0x251   :  { %1325 = vrot.lane.b32.xlu1 %v5638_v30, %s5479_s2 }
 0x2b7   :  { %v664_v31 = vpop.permute.xlu1 %663 }
 0x2b8   :  { %666 = vxpose.xlu0.b32.start.end [1/1] (short) (narrow) %v664_v31, 32 }
 0x2bb   :  { %v1291_v32 = vpop.permute.xlu1 %1290 }
 0x2bc   :  { %1293 = vxpose.xlu1.b32.start.end [1/1] (short) (narrow) %v1291_v32, 32 }
 0x2bf   :  { %v699_v33 = vpop.permute.xlu1 %698 }
 0x2c0   :  { %v745_v34 = vand.u32 4294901760, %v699_v33 }
 0x2c2   :  { %v852_v35 = vsub.f32 %v699_v33, %v745_v34  ;;  %4933 = vmatprep.subr.mxu0 %v745_v34 }
 0x2c3   :  { %4934 = vmatpush3.msra.mxu0 %v745_v34  ;;  %v1326_v40 = vpop.permute.xlu1 %1325 }
 0x2c4   :  { %4949 = vmatprep.subr.mxu0 %v852_v35  ;;  %v5646_v36 = vand.u32 4294901760, %v852_v35  ;;  %v5652_v43 = vand.u32 4294901760, %v1326_v40 }
 0x2c6   :  { %v854_v37 = vsub.f32 %v852_v35, %v5646_v36  ;;  %v5660_v50 = vsub.f32 %v1326_v40, %v5652_v43 }
 0x2c8   :  { %v855_v38 = vand.u32 4294901760, %v854_v37  ;;  %v5670_v63 = vand.u32 4294901760, %v5660_v50 }
 0x2ca   :  { %4941 = vmatprep.subr.mxu1 %v855_v38  ;;  %v1480_v8 = vsub.f32 %v5660_v50, %v5670_v63 }
 0x2cb   :  { %4942 = vmatpush3.msra.mxu1 %v855_v38 }
 0x2cc   :  { %4957 = vmatprep.subr.mxu1 %v745_v34  ;;  %v1481_v13 = vand.u32 4294901760, %v1480_v8 }
 0x2e6   :  { %2905 = vrot.lane.b32.xlu1 %v5529_v17, %s5482_s30 }
 0x2ea   :  { %2914 = vrot.lane.b32.xlu1 %v5630_v5, %s5482_s30 }
 0x2ed   :  { %2907 = vrot.lane.b32.xlu0 %v5524_v15, %s5482_s30 }
 0x2f1   :  { %2903 = vrot.lane.b32.xlu0 %v5539_v20, %s5482_s30 }
 0x2f5   :  { %2901 = vrot.lane.b32.xlu0 %v5553_v24, %s5482_s30 }
 0x334   :  { %v682_v39 = vpop.trf.xlu0 }
 0x335   :  { %v703_v41 = vsel %vm701_vm1, %v682_v39, 0 }
 0x336   :  { %v5650_v42 = vand.u32 4294901760, %v703_v41 }
 0x338   :  { %v781_v44 = vsub.f32 %v703_v41, %v5650_v42  ;;  %4943 = vmatprep.mubr.f32.mxu1 %v5650_v42  ;;  %v683_v45 = vpop.trf.xlu0  ;;  %v1309_v49 = vpop.trf.xlu1 }
 0x339   :  { %v706_v46 = vsel %vm701_vm1, %v683_v45, 0  ;;  %v1329_v12 = vsel %vm701_vm1, %v1309_v49, 0 }
 0x33a   :  { %v782_v47 = vand.u32 4294901760, %v781_v44  ;;  %v5657_v48 = vand.u32 4294901760, %v706_v46  ;;  %v5681_v18 = vand.u32 4294901760, %v1329_v12 }
 0x33c   :  { %v791_v52 = vsub.f32 %v706_v46, %v5657_v48  ;;  %v684_v53 = vpop.trf.xlu0  ;;  %4944 = vmatmul.mubr.f32.vlgmr.msra.gmra.mxu1 %v5657_v48  ;;  %v783_v54 = vsub.f32 %v781_v44, %v782_v47  ;;  %v1310_v0 = vpop.trf.xlu1  ;;  %v1407_v25 = vsub.f32 %v1329_v12, %v5681_v18 }
 0x33d   :  { %v709_v56 = vsel %vm701_vm1, %v684_v53, 0  ;;  %4958 = vmatpush3.msra.mxu1 %v745_v34  ;;  %v1332_v19 = vsel %vm701_vm1, %v1310_v0, 0  ;;  %v642_v53 = vlaneseq }
 0x33e   :  { %v792_v57 = vand.u32 4294901760, %v791_v52  ;;  %v5665_v58 = vand.u32 4294901760, %v709_v56  ;;  %4973 = vmatprep.subr.mxu1 %v745_v34  ;;  %v784_v59 = vand.u32 4294901760, %v783_v54  ;;  %v1416_v23 = vand.u32 4294901760, %v1332_v19 }
 0x33f   :  { %v1408_v32 = vand.u32 4294901760, %v1407_v25 }
 0x340   :  { %v793_v60 = vsub.f32 %v791_v52, %v792_v57  ;;  %v801_v61 = vsub.f32 %v709_v56, %v5665_v58  ;;  %4935 = vmatprep.mubr.f32.mxu0 %v784_v59  ;;  %v685_v62 = vpop.trf.xlu0  ;;  %4946 = vmatprep.mubr.f32.mxu1 %v5665_v58  ;;  %v1311_v11 = vpop.trf.xlu1  ;;  %v1417_v28 = vsub.f32 %v1332_v19, %v1416_v23 }
 0x341   :  { %v712_v1 = vsel %vm701_vm1, %v685_v62, 0  ;;  %v1335_v22 = vsel %vm701_vm1, %v1311_v11, 0 }
 0x342   :  { %v794_v2 = vand.u32 4294901760, %v793_v60  ;;  %v802_v3 = vand.u32 4294901760, %v801_v61  ;;  %v5673_v4 = vand.u32 4294901760, %v712_v1  ;;  %v1426_v27 = vand.u32 4294901760, %v1335_v22 }
 0x344   :  { %v811_v6 = vsub.f32 %v712_v1, %v5673_v4  ;;  %4936 = vmatmul.mubr.f32.vlgmr.msra.gmra.mxu0 %v794_v2  ;;  %4947 = vmatmul.mubr.f32.gmra.mxu1 %v5673_v4  ;;  %v803_v7 = vsub.f32 %v801_v61, %v802_v3  ;;  %v1312_v21 = vpop.trf.xlu1  ;;  %v1427_v33 = vsub.f32 %v1335_v22, %v1426_v27 }
 0x345   :  { %4950 = vmatpush3.msra.mxu0 %v852_v35  ;;  %4959 = vmatprep.mubr.f32.mxu1 %v782_v47  ;;  %v1338_v26 = vsel %vm701_vm1, %v1312_v21, 0 }
 0x346   :  { %v812_v9 = vand.u32 4294901760, %v811_v6  ;;  %4965 = vmatprep.subr.mxu0 %v5646_v36  ;;  %v804_v10 = vand.u32 4294901760, %v803_v7  ;;  %v1436_v31 = vand.u32 4294901760, %v1338_v26  ;;  %v1428_v37 = vand.u32 4294901760, %v1427_v33 }
 0x348   :  { %4938 = vmatprep.mubr.f32.mxu0 %v804_v10  ;;  %4960 = vmatmul.mubr.f32.vlgmr.msra.gmra.mxu1 %v792_v57  ;;  %v813_v14 = vsub.f32 %v811_v6, %v812_v9  ;;  %v1437_v35 = vsub.f32 %v1338_v26, %v1436_v31  ;;  %v1429_v41 = vsub.f32 %v1427_v33, %v1428_v37  ;;  %v643_v57 = vshrl.u32 %v642_v53, 7 }
 0x349   :  { %4974 = vmatpush3.msra.mxu1 %v745_v34  ;;  %4962 = vmatprep.mubr.f32.mxu1 %v802_v3  ;;  %v1418_v34 = vand.u32 4294901760, %v1417_v28 }
 0x34a   :  { %4989 = vmatprep.subr.mxu1 %v1481_v13  ;;  %v814_v16 = vand.u32 4294901760, %v813_v14  ;;  %v1438_v39 = vand.u32 4294901760, %v1437_v35  ;;  %v1430_v45 = vand.u32 4294901760, %v1429_v41  ;;  %v644_v60 = vadd.s32 8, %v643_v57 }
 0x34b   :  { %v1419_v38 = vsub.f32 %v1417_v28, %v1418_v34  ;;  %v647_v12 = vshra.s32 %v643_v57, 3 }
 0x34c   :  { %4939 = vmatmul.mubr.f32.gmra.mxu0 %v814_v16  ;;  %4963 = vmatmul.mubr.f32.gmra.mxu1 %v812_v9  ;;  %v648_v1 = vshra.s32 %v644_v60, 3  ;;  %v645_v9 = vadd.s32 16, %v643_v57 }
 0x34d   :  { %4951 = vmatprep.mubr.f32.mxu0 %v781_v44  ;;  %4975 = vmatprep.mubr.f32.mxu1 %v5650_v42  ;;  %v1439_v44 = vsub.f32 %v1437_v35, %v1438_v39 }
 0x34e   :  { %v649_v26 = vshra.s32 %v645_v9, 3 }
 0x34f   :  { %v1440_v46 = vand.u32 4294901760, %v1439_v44 }
 0x350   :  { %4952 = vmatmul.mubr.f32.vlgmr.msra.gmra.mxu0 %v791_v52  ;;  %4976 = vmatmul.mubr.f32.vlgmr.msra.gmra.mxu1 %v5657_v48 }
 0x351   :  { %4966 = vmatpush3.msra.mxu0 %v5646_v36  ;;  %4990 = vmatpush3.msra.mxu1 %v1481_v13  ;;  %v1409_v36 = vsub.f32 %v1407_v25, %v1408_v32  ;;  %v1923_v13 = vsel %vm60_vm0, %v5634_v29, 0 }
 0x352   :  { %4954 = vmatprep.mubr.f32.mxu0 %v801_v61  ;;  %4978 = vmatprep.mubr.f32.mxu1 %v5665_v58  ;;  %v652_v61 = vand.u32 127, %v642_v53 }
 0x353   :  { %4981 = vmatprep.subr.mxu0 %v5652_v43  ;;  %5005 = vmatprep.subr.mxu1 %v5652_v43  ;;  %v1410_v40 = vand.u32 4294901760, %v1409_v36 }
 0x354   :  { %4955 = vmatmul.mubr.f32.gmra.mxu0 %v811_v6  ;;  %4979 = vmatmul.mubr.f32.gmra.mxu1 %v5673_v4  ;;  %v653_v2 = vshra.s32 %v652_v61, 3  ;;  %v646_v6 = vadd.s32 24, %v643_v57 }
 0x355   :  { %4967 = vmatprep.mubr.f32.mxu0 %v5650_v42  ;;  %4991 = vmatprep.mubr.f32.mxu1 %v5681_v18  ;;  %v1420_v42 = vand.u32 4294901760, %v1419_v38 }
 0x356   :  { %vm655_vm3 = vcmp.eq.s32.totalorder %v648_v1, %v653_v2  ;;  %v650_v22 = vshra.s32 %v646_v6, 3  ;;  %vm654_vm4 = vcmp.eq.s32.totalorder %v647_v12, %v653_v2  ;;  %vm656_vm6 = vcmp.eq.s32.totalorder %v649_v26, %v653_v2 }
 0x358   :  { %4968 = vmatmul.mubr.f32.vlgmr.msra.gmra.mxu0 %v5657_v48  ;;  %4992 = vmatmul.mubr.f32.vlgmr.msra.gmra.mxu1 %v1416_v23  ;;  %vm657_vm5 = vcmp.eq.s32.totalorder %v650_v22, %v653_v2 }
 0x359   :  { %4982 = vmatpush3.msra.mxu0 %v5652_v43  ;;  %5006 = vmatpush3.msra.mxu1 %v5652_v43 }
 0x35a   :  { %4970 = vmatprep.mubr.f32.mxu0 %v5665_v58  ;;  %4994 = vmatprep.mubr.f32.mxu1 %v1426_v27 }
 0x35b   :  { %4997 = vmatprep.subr.mxu0 %v5660_v50  ;;  %5021 = vmatprep.subr.mxu1 %v5652_v43 }
 0x35c   :  { %4971 = vmatmul.mubr.f32.gmra.mxu0 %v5673_v4  ;;  %4995 = vmatmul.mubr.f32.gmra.mxu1 %v1436_v31 }
 0x35d   :  { %4983 = vmatprep.mubr.f32.mxu0 %v1410_v40  ;;  %5007 = vmatprep.mubr.f32.mxu1 %v1408_v32  ;;  %v5727_v32 = vand.u32 4294901760, %v1923_v13 }
 0x360   :  { %4984 = vmatmul.mubr.f32.vlgmr.msra.gmra.mxu0 %v1420_v42  ;;  %5008 = vmatmul.mubr.f32.vlgmr.msra.gmra.mxu1 %v1418_v34 }
 0x361   :  { %4998 = vmatpush3.msra.mxu0 %v5660_v50  ;;  %5022 = vmatpush3.msra.mxu1 %v5652_v43  ;;  %v5480_v43 = vmov 0.0  }
 0x362   :  { %4986 = vmatprep.mubr.f32.mxu0 %v1430_v45  ;;  %5010 = vmatprep.mubr.f32.mxu1 %v1428_v37  ;;  %v5733_v38 = vsel %vm654_vm4, 0.17677669, %v5480_v43 }
 0x363   :  { %5013 = vmatprep.subr.mxu0 %v5670_v63  ;;  %5040 = vmatprep.subr.mxu1 %v5480_v43 }
 0x364   :  { %4987 = vmatmul.mubr.f32.gmra.mxu0 %v1440_v46  ;;  %5011 = vmatmul.mubr.f32.gmra.mxu1 %v1438_v39  ;;  %v5737_v46 = vsub.f32 %v1923_v13, %v5727_v32 }
 0x365   :  { %4999 = vmatprep.mubr.f32.mxu0 %v1407_v25  ;;  %5023 = vmatprep.mubr.f32.mxu1 %v5681_v18 }
 0x368   :  { %5000 = vmatmul.mubr.f32.vlgmr.msra.gmra.mxu0 %v1417_v28  ;;  %5024 = vmatmul.mubr.f32.vlgmr.msra.gmra.mxu1 %v1416_v23 }
 0x369   :  { %5014 = vmatpush3.msra.mxu0 %v5670_v63  ;;  %5002 = vmatprep.mubr.f32.mxu0 %v1427_v33  ;;  %v5730_v33 = vsel %vm655_vm3, 0.17677669, %v5480_v43 }
 0x36a   :  { %5026 = vmatprep.mubr.f32.mxu1 %v1426_v27  ;;  %5029 = vmatprep.subr.mxu0 %v5480_v43 }
 0x36c   :  { %5003 = vmatmul.mubr.f32.gmra.mxu0 %v1437_v35  ;;  %5027 = vmatmul.mubr.f32.gmra.mxu1 %v1436_v31 }
 0x36d   :  { %5015 = vmatprep.mubr.f32.mxu0 %v5681_v18  ;;  %5048 = vmatprep.mubr.msk.f32.mxu1 %vm5481_vm2, %v5480_v43 }
 0x370   :  { %5016 = vmatmul.mubr.f32.vlgmr.msra.gmra.mxu0 %v1416_v23 }
 0x371   :  { %5018 = vmatprep.mubr.f32.mxu0 %v1426_v27 }
 0x374   :  { %5019 = vmatmul.mubr.f32.gmra.mxu0 %v1436_v31 }
 0x375   :  { %5037 = vmatprep.mubr.msk.f32.mxu0 %vm5481_vm2, %v5480_v43 }
 0x3fc   :  { %v4945_v47 = vpop.f32.mrf.mxu1 }
 0x3fe   :  { %v892_v48 = vpop.f32.mrf.mxu1 }
 0x404   :  { %v4948_v49 = vpop.f32.mrf.mxu1  ;;  %v4937_v50 = vpop.f32.mrf.mxu0 }
 0x405   :  { %v899_v63 = vadd.f32 %v4945_v47, %v4937_v50  ;;  %v5740_v47 = vsel %vm657_vm5, 0.17677669, %v5480_v43 }
 0x406   :  { %v904_v52 = vpop.f32.mrf.mxu1  ;;  %v786_v15 = vpop.f32.mrf.mxu0 }
 0x407   :  { %v893_v3 = vadd.f32 %v892_v48, %v786_v15  ;;  %v5746_v15 = vsel %vm656_vm6, 0.17677669, %v5480_v43 }
 0x408   :  { %v4961_v54 = vpop.f32.mrf.mxu1 }
 0x40a   :  { %v1079_v56 = vpop.f32.mrf.mxu1 }
 0x40c   :  { %v4940_v17 = vpop.f32.mrf.mxu0  ;;  %v4964_v58 = vpop.f32.mrf.mxu1 }
 0x40d   :  { %v911_v10 = vadd.f32 %v4948_v49, %v4940_v17 }
 0x40e   :  { %v806_v59 = vpop.f32.mrf.mxu0  ;;  %v1095_v20 = vpop.f32.mrf.mxu1 }
 0x40f   :  { %v905_v18 = vadd.f32 %v904_v52, %v806_v59 }
 0x410   :  { %v4953_v5 = vpop.f32.mrf.mxu0  ;;  %v4977_v62 = vpop.f32.mrf.mxu1 }
 0x411   :  { %v992_v4 = vadd.f32 %v4953_v5, %v899_v63 }
 0x412   :  { %v984_v24 = vpop.f32.mrf.mxu0  ;;  %v1267_v0 = vpop.f32.mrf.mxu1 }
 0x413   :  { %v985_v11 = vadd.f32 %v984_v24, %v893_v3  ;;  %v1088_v21 = vadd.f32 %v4961_v54, %v992_v4 }
 0x414   :  { %v4956_v7 = vpop.f32.mrf.mxu0  ;;  %v4980_v8 = vpop.f32.mrf.mxu1 }
 0x415   :  { %v1006_v19 = vadd.f32 %v4956_v7, %v911_v10  ;;  %v1080_v31 = vadd.f32 %v1079_v56, %v985_v11 }
 0x416   :  { %v998_v14 = vpop.f32.mrf.mxu0  ;;  %v1279_v16 = vpop.f32.mrf.mxu1 }
 0x417   :  { %v999_v27 = vadd.f32 %v998_v14, %v905_v18  ;;  %v1104_v37 = vadd.f32 %v4964_v58, %v1006_v19 }
 0x418   :  { %v4969_v23 = vpop.f32.mrf.mxu0  ;;  %v4993_v25 = vpop.f32.mrf.mxu1 }
 0x419   :  { %v1184_v28 = vadd.f32 %v4969_v23, %v1088_v21  ;;  %v1096_v45 = vadd.f32 %v1095_v20, %v999_v27  ;;  %v1996_v20 = vand.u32 4294901760, %v5737_v46 }
 0x41a   :  { %v1177_v29 = vpop.f32.mrf.mxu0  ;;  %v1518_v34 = vpop.f32.mrf.mxu1 }
 0x41b   :  { %v1274_v35 = vadd.f32 %v4977_v62, %v1184_v28  ;;  %v1178_v36 = vadd.f32 %v1177_v29, %v1080_v31  ;;  %v1997_v6 = vsub.f32 %v5737_v46, %v1996_v20 }
 0x41c   :  { %v4972_v39 = vpop.f32.mrf.mxu0  ;;  %v4996_v40 = vpop.f32.mrf.mxu1 }
 0x41d   :  { %v1916_v41 = vmul.f32 %v1274_v35, %v5730_v33  ;;  %v1268_v42 = vadd.f32 %v1267_v0, %v1178_v36  ;;  %v1196_v44 = vadd.f32 %v4972_v39, %v1104_v37  ;;  %v1998_v21 = vand.u32 4294901760, %v1997_v6 }
 0x41e   :  { %v1189_v48 = vpop.f32.mrf.mxu0  ;;  %v1530_v49 = vpop.f32.mrf.mxu1 }
 0x41f   :  { %v5742_v50 = vand.u32 4294901760, %v1916_v41  ;;  %v1915_v52 = vmul.f32 %v1268_v42, %v5733_v38  ;;  %v1286_v53 = vadd.f32 %v4980_v8, %v1196_v44  ;;  %v1190_v54 = vadd.f32 %v1189_v48, %v1096_v45 }
 0x420   :  { %v4985_v56 = vpop.f32.mrf.mxu0  ;;  %v5009_v57 = vpop.f32.mrf.mxu1 }
 0x421   :  { %v5748_v17 = vand.u32 4294901760, %v1915_v52  ;;  %v1918_v58 = vmul.f32 %v1286_v53, %v5740_v47  ;;  %v1280_v59 = vadd.f32 %v1279_v16, %v1190_v54  ;;  %v5753_v5 = vsub.f32 %v1916_v41, %v5742_v50 }
 0x422   :  { %v1412_v60 = vpop.f32.mrf.mxu0  ;;  %v1705_v61 = vpop.f32.mrf.mxu1  ;;  %v1525_v12 = vadd.f32 %v4993_v25, %v4985_v56 }
 0x423   :  { %v5755_v62 = vand.u32 4294901760, %v1918_v58  ;;  %v1917_v63 = vmul.f32 %v1280_v59, %v5746_v15  ;;  %v5761_v1 = vsub.f32 %v1915_v52, %v5748_v17  ;;  %v2045_v9 = vand.u32 4294901760, %v5753_v5 }
 0x424   :  { %v4988_v24 = vpop.f32.mrf.mxu0  ;;  %v5758_v0 = vpop.f32.mrf.mxu1  ;;  %v1519_v18 = vadd.f32 %v1518_v34, %v1412_v60 }
 0x425   :  { %v5764_v2 = vsub.f32 %v1918_v58, %v5755_v62  ;;  %v5766_v3 = vand.u32 4294901760, %v1917_v63  ;;  %5030 = vmatpush3.msra.mxu0 %v5755_v62  ;;  %v2052_v16 = vand.u32 4294901760, %v5761_v1  ;;  %v2046_v26 = vsub.f32 %v5753_v5, %v2045_v9 }
 0x426   :  { %v1432_v4 = vpop.f32.mrf.mxu0  ;;  %5031 = vmatprep.subr.mxu0 %v5480_v43  ;;  %v1721_v10 = vpop.f32.mrf.mxu1  ;;  %v1537_v31 = vadd.f32 %v4996_v40, %v4988_v24 }
 0x427   :  { %v5774_v7 = vsub.f32 %v1917_v63, %v5766_v3  ;;  %5032 = vmatpush3.msra.mxu0 %v5766_v3  ;;  %v2031_v8 = vand.u32 4294901760, %v5764_v2  ;;  %v2053_v35 = vsub.f32 %v5761_v1, %v2052_v16  ;;  %v1531_v37 = vadd.f32 %v1530_v49, %v1432_v4 }
 0x428   :  { %v5001_v11 = vpop.f32.mrf.mxu0  ;;  %5033 = vmatprep.subr.mxu0 %v5480_v43  ;;  %v5025_v27 = vpop.f32.mrf.mxu1  ;;  %v2047_v41 = vand.u32 4294901760, %v2046_v26 }
 0x429   :  { %5034 = vmatpush3.msra.mxu0 %v5742_v50  ;;  %v2032_v13 = vsub.f32 %v5764_v2, %v2031_v8  ;;  %v2038_v14 = vand.u32 4294901760, %v5774_v7  ;;  %v1618_v22 = vadd.f32 %v5001_v11, %v1525_v12  ;;  %v2054_v53 = vand.u32 4294901760, %v2053_v35 }
 0x42a   :  { %v1610_v19 = vpop.f32.mrf.mxu0  ;;  %5035 = vmatprep.subr.mxu0 %v5480_v43  ;;  %v1893_v42 = vpop.f32.mrf.mxu1 }
 0x42b   :  { %5036 = vmatpush3.msra.mxu0 %v5748_v17  ;;  %v2033_v23 = vand.u32 4294901760, %v2032_v13  ;;  %v2039_v25 = vsub.f32 %v5774_v7, %v2038_v14  ;;  %v1611_v29 = vadd.f32 %v1610_v19, %v1519_v18  ;;  %v1714_v40 = vadd.f32 %v5009_v57, %v1618_v22 }
 0x42c   :  { %v5004_v28 = vpop.f32.mrf.mxu0  ;;  %5038 = vmatmul.mubr.f32.vlgmr.msra.gmra.mxu0 %v1998_v21  ;;  %5051 = vmatprep.subr.mxu0 %v5480_v43  ;;  %v2410_v57 = vsel %vm60_vm0, %v5638_v30, 0  ;;  %v5028_v58 = vpop.f32.mrf.mxu1 }
 0x42d   :  { %5041 = vmatpush3.msra.mxu1 %v2033_v23  ;;  %5052 = vmatpush3.msra.mxu0 %v5764_v2  ;;  %v2040_v34 = vand.u32 4294901760, %v2039_v25  ;;  %v1632_v39 = vadd.f32 %v5004_v28, %v1537_v31  ;;  %v1706_v52 = vadd.f32 %v1705_v61, %v1611_v29  ;;  %v2906_v29 = vpop.permute.xlu1 %2905 }
 0x42e   :  { %v1624_v36 = vpop.f32.mrf.mxu0  ;;  %5042 = vmatprep.subr.mxu1 %v5480_v43  ;;  %5053 = vmatprep.subr.mxu0 %v5480_v43  ;;  %v1905_v11 = vpop.f32.mrf.mxu1 }
 0x42f   :  { %5043 = vmatpush3.msra.mxu1 %v2040_v34  ;;  %5054 = vmatpush3.msra.mxu0 %v5774_v7  ;;  %v1625_v45 = vadd.f32 %v1624_v36, %v1531_v37  ;;  %v1730_v56 = vadd.f32 %v5758_v0, %v1632_v39  ;;  %v5818_v0 = vand.u32 4294901760, %v2410_v57  ;;  %v5956_v34 = vand.u32 4294901760, %v2906_v29 }
 0x430   :  { %v5017_v44 = vpop.f32.mrf.mxu0  ;;  %5044 = vmatprep.subr.mxu1 %v5480_v43  ;;  %5055 = vmatprep.subr.mxu0 %v5480_v43 }
 0x431   :  { %v1810_v48 = vadd.f32 %v5017_v44, %v1714_v40  ;;  %5045 = vmatpush3.msra.mxu1 %v2047_v41  ;;  %5056 = vmatpush3.msra.mxu0 %v5753_v5  ;;  %v1722_v63 = vadd.f32 %v1721_v10, %v1625_v45 }
 0x432   :  { %v1803_v49 = vpop.f32.mrf.mxu0  ;;  %5046 = vmatprep.subr.mxu1 %v5480_v43  ;;  %5057 = vmatprep.subr.mxu0 %v5480_v43 }
 0x433   :  { %v1804_v54 = vadd.f32 %v1803_v49, %v1706_v52  ;;  %5047 = vmatpush3.msra.mxu1 %v2054_v53  ;;  %5058 = vmatpush3.msra.mxu0 %v5761_v1  ;;  %v1900_v59 = vadd.f32 %v5025_v27, %v1810_v48  ;;  %v2908_v27 = vpop.permute.xlu0 %2907 }
 0x434   :  { %5059 = vmatprep.mubr.msk.f32.mxu0 %vm5481_vm2, %v5480_v43  ;;  %v5020_v60 = vpop.f32.mrf.mxu0  ;;  %5049 = vmatmul.mubr.f32.vlgmr.msra.gmra.mxu1 %v5727_v32  ;;  %v5952_v28 = vand.u32 4294901760, %v2908_v27 }
 0x435   :  { %v1822_v61 = vadd.f32 %v5020_v60, %v1730_v56  ;;  %5060 = vmatmul.mubr.f32.vlgmr.msra.gmra.mxu0 %v5737_v46  ;;  %5062 = vmatprep.subr.mxu1 %v5480_v43  ;;  %v1894_v24 = vadd.f32 %v1893_v42, %v1804_v54  ;;  %v1920_v12 = vmul.f32 %v1900_v59, %v5730_v33 }
 0x436   :  { %5073 = vmatprep.subr.mxu0 %v5480_v43  ;;  %5063 = vmatpush3.msra.mxu1 %v5755_v62  ;;  %v1815_v30 = vpop.f32.mrf.mxu0  ;;  %v5834_v33 = vsub.f32 %v2410_v57, %v5818_v0  ;;  %v5959_v35 = vsub.f32 %v2908_v27, %v5952_v28 }
 0x437   :  { %v1912_v4 = vadd.f32 %v5028_v58, %v1822_v61  ;;  %5074 = vmatpush3.msra.mxu0 %v2031_v8  ;;  %v1816_v6 = vadd.f32 %v1815_v30, %v1722_v63  ;;  %5064 = vmatprep.subr.mxu1 %v5480_v43  ;;  %v1919_v2 = vmul.f32 %v1894_v24, %v5733_v38  ;;  %v2904_v31 = vpop.permute.xlu0 %2903 }
 0x438   :  { %5075 = vmatprep.subr.mxu0 %v5480_v43  ;;  %5065 = vmatpush3.msra.mxu1 %v5766_v3  ;;  %v5961_v36 = vand.u32 4294901760, %v2904_v31  ;;  %v5975_v41 = vand.u32 4294901760, %v5959_v35 }
 0x439   :  { %v1922_v10 = vmul.f32 %v1912_v4, %v5740_v47  ;;  %v1906_v13 = vadd.f32 %v1905_v11, %v1816_v6  ;;  %5076 = vmatpush3.msra.mxu0 %v2038_v14  ;;  %5066 = vmatprep.subr.mxu1 %v5480_v43  ;;  %v5842_v47 = vand.u32 4294901760, %v1920_v12 }
 0x43a   :  { %5077 = vmatprep.subr.mxu0 %v5480_v43  ;;  %5067 = vmatpush3.msra.mxu1 %v5742_v50  ;;  %v5972_v40 = vsub.f32 %v2904_v31, %v5961_v36  ;;  %v3040_v44 = vsub.f32 %v5959_v35, %v5975_v41 }
 0x43b   :  { %v5836_v8 = vand.u32 4294901760, %v1922_v10  ;;  %v1921_v18 = vmul.f32 %v1906_v13, %v5746_v15  ;;  %5078 = vmatpush3.msra.mxu0 %v2045_v9  ;;  %5068 = vmatprep.subr.mxu1 %v5480_v43  ;;  %v5855_v15 = vand.u32 4294901760, %v1919_v2  ;;  %v2483_v9 = vand.u32 4294901760, %v5834_v33  ;;  %v2902_v37 = vpop.permute.xlu0 %2901 }
 0x43c   :  { %5079 = vmatprep.subr.mxu0 %v5480_v43  ;;  %5069 = vmatpush3.msra.mxu1 %v5748_v17  ;;  %v5869_v14 = vsub.f32 %v1920_v12, %v5842_v47  ;;  %v5968_v39 = vand.u32 4294901760, %v2902_v37  ;;  %v3041_v48 = vand.u32 4294901760, %v3040_v44  ;;  %v5992_v53 = vand.u32 4294901760, %v5972_v40 }
 0x43d   :  { %v5847_v38 = vsub.f32 %v1922_v10, %v5836_v8  ;;  %v5849_v7 = vand.u32 4294901760, %v1921_v18  ;;  %5070 = vmatprep.mubr.msk.f32.mxu1 %vm5481_vm2, %v5480_v43  ;;  %5080 = vmatpush3.msra.mxu0 %v2052_v16 }
 0x43e   :  { %5081 = vmatprep.mubr.msk.f32.mxu0 %vm5481_vm2, %v5480_v43  ;;  %5071 = vmatmul.mubr.f32.vlgmr.msra.gmra.mxu1 %v1996_v20  ;;  %v5877_v20 = vsub.f32 %v1919_v2, %v5855_v15  ;;  %v2532_v21 = vand.u32 4294901760, %v5869_v14  ;;  %v5980_v42 = vsub.f32 %v2902_v37, %v5968_v39  ;;  %v3054_v54 = vsub.f32 %v5972_v40, %v5992_v53 }
 0x43f   :  { %v5862_v5 = vsub.f32 %v1921_v18, %v5849_v7  ;;  %5082 = vmatmul.mubr.f32.vlgmr.msra.gmra.mxu0 %v5727_v32  ;;  %5084 = vmatprep.subr.mxu1 %v5480_v43  ;;  %v2518_v1 = vand.u32 4294901760, %v5847_v38 }
 0x440   :  { %5095 = vmatprep.subr.mxu0 %v5480_v43  ;;  %5085 = vmatpush3.msra.mxu1 %v5755_v62  ;;  %v2484_v62 = vsub.f32 %v5834_v33, %v2483_v9  ;;  %v2539_v22 = vand.u32 4294901760, %v5877_v20  ;;  %v2533_v25 = vsub.f32 %v5869_v14, %v2532_v21  ;;  %v5997_v56 = vand.u32 4294901760, %v5980_v42 }
 0x441   :  { %5096 = vmatpush3.msra.mxu0 %v5836_v8  ;;  %5086 = vmatprep.subr.mxu1 %v5480_v43  ;;  %v2525_v46 = vand.u32 4294901760, %v5862_v5  ;;  %v2519_v16 = vsub.f32 %v5847_v38, %v2518_v1  ;;  %v3055_v57 = vand.u32 4294901760, %v3054_v54 }
 0x442   :  { %5097 = vmatprep.subr.mxu0 %v5480_v43  ;;  %5087 = vmatpush3.msra.mxu1 %v5766_v3  ;;  %v2534_v26 = vand.u32 4294901760, %v2533_v25  ;;  %v3061_v58 = vsub.f32 %v5980_v42, %v5997_v56 }
 0x443   :  { %5098 = vmatpush3.msra.mxu0 %v5849_v7  ;;  %5088 = vmatprep.subr.mxu1 %v5480_v43  ;;  %v2526_v19 = vsub.f32 %v5862_v5, %v2525_v46  ;;  %v2520_v3 = vand.u32 4294901760, %v2519_v16 }
 0x444   :  { %5099 = vmatprep.subr.mxu0 %v5480_v43  ;;  %5089 = vmatpush3.msra.mxu1 %v5742_v50  ;;  %v2485_v50 = vand.u32 4294901760, %v2484_v62  ;;  %v3062_v59 = vand.u32 4294901760, %v3061_v58 }
 0x445   :  { %5100 = vmatpush3.msra.mxu0 %v5842_v47  ;;  %5090 = vmatprep.subr.mxu1 %v5480_v43  ;;  %v2527_v23 = vand.u32 4294901760, %v2526_v19 }
 0x446   :  { %5101 = vmatprep.subr.mxu0 %v5480_v43  ;;  %5091 = vmatpush3.msra.mxu1 %v5748_v17  ;;  %v2540_v17 = vsub.f32 %v5877_v20, %v2539_v22 }
 0x447   :  { %5092 = vmatprep.mubr.msk.f32.mxu1 %vm5481_vm2, %v5480_v43  ;;  %5102 = vmatpush3.msra.mxu0 %v5855_v15 }
 0x448   :  { %5103 = vmatprep.mubr.msk.f32.mxu0 %vm5481_vm2, %v5480_v43  ;;  %5093 = vmatmul.mubr.f32.vlgmr.msra.gmra.mxu1 %v5727_v32  ;;  %v2541_v32 = vand.u32 4294901760, %v2540_v17 }
 0x449   :  { %5104 = vmatmul.mubr.f32.vlgmr.msra.gmra.mxu0 %v2485_v50  ;;  %5106 = vmatprep.subr.mxu1 %v5480_v43 }
 0x44a   :  { %5117 = vmatprep.subr.mxu0 %v5480_v43  ;;  %5107 = vmatpush3.msra.mxu1 %v2520_v3 }
 0x44b   :  { %5118 = vmatpush3.msra.mxu0 %v5847_v38  ;;  %5108 = vmatprep.subr.mxu1 %v5480_v43 }
 0x44c   :  { %5119 = vmatprep.subr.mxu0 %v5480_v43  ;;  %5109 = vmatpush3.msra.mxu1 %v2527_v23 }
 0x44d   :  { %5120 = vmatpush3.msra.mxu0 %v5862_v5  ;;  %5110 = vmatprep.subr.mxu1 %v5480_v43 }
 0x44e   :  { %5121 = vmatprep.subr.mxu0 %v5480_v43  ;;  %5111 = vmatpush3.msra.mxu1 %v2534_v26 }
 0x44f   :  { %5122 = vmatpush3.msra.mxu0 %v5869_v14  ;;  %5112 = vmatprep.subr.mxu1 %v5480_v43 }
 0x450   :  { %5123 = vmatprep.subr.mxu0 %v5480_v43  ;;  %5113 = vmatpush3.msra.mxu1 %v2541_v32 }
 0x451   :  { %5114 = vmatprep.mubr.msk.f32.mxu1 %vm5481_vm2, %v5480_v43  ;;  %5124 = vmatpush3.msra.mxu0 %v5877_v20 }
 0x452   :  { %5125 = vmatprep.mubr.msk.f32.mxu0 %vm5481_vm2, %v5480_v43  ;;  %5115 = vmatmul.mubr.f32.vlgmr.msra.gmra.mxu1 %v5818_v0 }
 0x453   :  { %5126 = vmatmul.mubr.f32.vlgmr.msra.gmra.mxu0 %v5834_v33  ;;  %5128 = vmatprep.subr.mxu1 %v5480_v43 }
 0x454   :  { %5139 = vmatprep.subr.mxu0 %v5480_v43  ;;  %5129 = vmatpush3.msra.mxu1 %v5836_v8 }
 0x455   :  { %5140 = vmatpush3.msra.mxu0 %v2518_v1  ;;  %5130 = vmatprep.subr.mxu1 %v5480_v43 }
 0x456   :  { %5141 = vmatprep.subr.mxu0 %v5480_v43  ;;  %5131 = vmatpush3.msra.mxu1 %v5849_v7 }
 0x457   :  { %5142 = vmatpush3.msra.mxu0 %v2525_v46  ;;  %5132 = vmatprep.subr.mxu1 %v5480_v43 }
 0x458   :  { %5143 = vmatprep.subr.mxu0 %v5480_v43  ;;  %5133 = vmatpush3.msra.mxu1 %v5842_v47 }
 0x459   :  { %5144 = vmatpush3.msra.mxu0 %v2532_v21  ;;  %5134 = vmatprep.subr.mxu1 %v5480_v43 }
 0x45a   :  { %5145 = vmatprep.subr.mxu0 %v5480_v43  ;;  %5135 = vmatpush3.msra.mxu1 %v5855_v15 }
 0x45b   :  { %5136 = vmatprep.mubr.msk.f32.mxu1 %vm5481_vm2, %v5480_v43  ;;  %5146 = vmatpush3.msra.mxu0 %v2539_v22 }
 0x45c   :  { %5147 = vmatprep.mubr.msk.f32.mxu0 %vm5481_vm2, %v5480_v43  ;;  %5137 = vmatmul.mubr.f32.vlgmr.msra.gmra.mxu1 %v2483_v9 }
 0x45d   :  { %5148 = vmatmul.mubr.f32.vlgmr.msra.gmra.mxu0 %v5818_v0  ;;  %5150 = vmatprep.subr.mxu1 %v5480_v43 }
 0x45e   :  { %5151 = vmatpush3.msra.mxu1 %v5836_v8  ;;  %5158 = vmatprep.mubr.msk.f32.mxu1 %vm5481_vm2, %v5480_v43 }
 0x45f   :  { %5152 = vmatprep.subr.mxu1 %v5480_v43  ;;  %5161 = vmatprep.subr.mxu0 %v5952_v28 }
 0x460   :  { %5153 = vmatpush3.msra.mxu1 %v5849_v7  ;;  %5162 = vmatpush3.msra.mxu0 %v5952_v28 }
 0x461   :  { %5154 = vmatprep.subr.mxu1 %v5480_v43  ;;  %5163 = vmatprep.subr.mxu0 %v5956_v34 }
 0x462   :  { %5155 = vmatpush3.msra.mxu1 %v5842_v47  ;;  %5164 = vmatpush3.msra.mxu0 %v5956_v34 }
 0x463   :  { %5156 = vmatprep.subr.mxu1 %v5480_v43  ;;  %v5965_v43 = vsub.f32 %v2906_v29, %v5956_v34  ;;  %5165 = vmatprep.subr.mxu0 %v5961_v36 }
 0x464   :  { %5157 = vmatpush3.msra.mxu1 %v5855_v15  ;;  %5166 = vmatpush3.msra.mxu0 %v5961_v36 }
 0x465   :  { %5159 = vmatmul.mubr.f32.vlgmr.msra.gmra.mxu1 %v5818_v0  ;;  %5167 = vmatprep.subr.mxu0 %v5968_v39  ;;  %v5985_v45 = vand.u32 4294901760, %v5965_v43 }
 0x466   :  { %5168 = vmatpush3.msra.mxu0 %v5968_v39  ;;  %5172 = vmatprep.subr.mxu1 %v3041_v48 }
 0x467   :  { %5183 = vmatprep.subr.mxu0 %v5959_v35  ;;  %v3047_v52 = vsub.f32 %v5965_v43, %v5985_v45  ;;  %5173 = vmatpush3.msra.mxu1 %v3041_v48 }
 0x469   :  { %v3048_v49 = vand.u32 4294901760, %v3047_v52 }
 0x46b   :  { %5174 = vmatprep.subr.mxu1 %v3048_v49 }
 0x46c   :  { %5175 = vmatpush3.msra.mxu1 %v3048_v49 }
 0x46d   :  { %5176 = vmatprep.subr.mxu1 %v3055_v57 }
 0x46e   :  { %5177 = vmatpush3.msra.mxu1 %v3055_v57 }
 0x46f   :  { %5178 = vmatprep.subr.mxu1 %v3062_v59 }
 0x470   :  { %5179 = vmatpush3.msra.mxu1 %v3062_v59 }
 0x471   :  { %5194 = vmatprep.subr.mxu1 %v5952_v28 }
 0x4ec   :  { %v2000_v60 = vpop.f32.mrf.mxu0 }
 0x4ee   :  { %v5039_v61 = vpop.f32.mrf.mxu0 }
 0x4f4   :  { %v2091_v63 = vpop.f32.mrf.mxu1 }
 0x4f5   :  { %v2171_v24 = vpop.f32.mrf.mxu0  ;;  %v2092_v4 = vadd.f32 %v2091_v63, %v2000_v60 }
 0x4f6   :  { %v5050_v30 = vpop.f32.mrf.mxu1 }
 0x4f7   :  { %v5061_v0 = vpop.f32.mrf.mxu0  ;;  %v2172_v10 = vadd.f32 %v2171_v24, %v2092_v4 }
 0x4fe   :  { %v2248_v6 = vpop.f32.mrf.mxu1 }
 0x4ff   :  { %v2331_v11 = vpop.f32.mrf.mxu0  ;;  %v2249_v2 = vadd.f32 %v2248_v6, %v2172_v10 }
 0x500   :  { %v5072_v12 = vpop.f32.mrf.mxu1 }
 0x501   :  { %v5083_v13 = vpop.f32.mrf.mxu0  ;;  %v2332_v33 = vadd.f32 %v2331_v11, %v2249_v2 }
 0x508   :  { %v2406_v8 = vpop.f32.mrf.mxu1 }
 0x509   :  { %v2407_v18 = vadd.f32 %v2406_v8, %v2332_v33  ;;  %v2487_v47 = vpop.f32.mrf.mxu0  ;;  %v5384_v33 = vld [vmem:[#allocation7 + $0x1] ss:$0 sm:$0xff] }
 0x50a   :  { %v5094_v38 = vpop.f32.mrf.mxu1 }
 0x50b   :  { %v2918_v7 = vsel %vm60_vm0, %v2407_v18, 0  ;;  %v5105_v15 = vpop.f32.mrf.mxu0 }
 0x50c   :  { %v2992_v5 = vand.u32 4294901760, %v2918_v7 }
 0x50e   :  { %v2993_v9 = vsub.f32 %v2918_v7, %v2992_v5  ;;  %5180 = vmatprep.mubr.f32.mxu1 %v2992_v5 }
 0x510   :  { %v2994_v1 = vand.u32 4294901760, %v2993_v9 }
 0x512   :  { %v2578_v14 = vpop.f32.mrf.mxu1  ;;  %v2995_v46 = vsub.f32 %v2993_v9, %v2994_v1 }
 0x513   :  { %v2658_v20 = vpop.f32.mrf.mxu0  ;;  %v2579_v21 = vadd.f32 %v2578_v14, %v2487_v47 }
 0x514   :  { %v5116_v16 = vpop.f32.mrf.mxu1  ;;  %v2996_v62 = vand.u32 4294901760, %v2995_v46  ;;  %v3491_v46 = vld [vmem:[#allocation5 + $0x38] sm:$0xff] }
 0x515   :  { %v5127_v19 = vpop.f32.mrf.mxu0  ;;  %v2659_v50 = vadd.f32 %v2658_v20, %v2579_v21  ;;  %v6050_v16 = vand.u32 4294901760, %v3491_v46 }
 0x516   :  { %5169 = vmatprep.mubr.f32.mxu0 %v2996_v62  ;;  %v3490_v62 = vld [vmem:[#allocation5 + $0x20] sm:$0xff] }
 0x517   :  { %v6059_v21 = vsub.f32 %v3491_v46, %v6050_v16  ;;  %v4041_v46 = vld [vmem:[#allocation5 + $0x10] sm:$0xff] }
 0x51c   :  { %v2735_v3 = vpop.f32.mrf.mxu1 }
 0x51d   :  { %v2818_v22 = vpop.f32.mrf.mxu0  ;;  %v2736_v17 = vadd.f32 %v2735_v3, %v2659_v50  ;;  %v6061_v3 = vand.u32 4294901760, %v3490_v62 }
 0x51e   :  { %v5138_v23 = vpop.f32.mrf.mxu1 }
 0x51f   :  { %v5149_v25 = vpop.f32.mrf.mxu0  ;;  %v2819_v26 = vadd.f32 %v2818_v22, %v2736_v17  ;;  %v3489_v22 = vld [vmem:[#allocation5 + $0x8] sm:$0xff]  ;;  %v6068_v23 = vand.u32 4294901760, %v6059_v21 }
 0x520   :  { %v6071_v25 = vsub.f32 %v3490_v62, %v6061_v3  ;;  %v6073_v17 = vand.u32 4294901760, %v3489_v22  ;;  %v6169_v62 = vand.u32 4294901760, %v4041_v46 }
 0x525   :  { %v2893_v32 = vpop.f32.mrf.mxu1 }
 0x526   :  { %v2894_v27 = vadd.f32 %v2893_v32, %v2819_v26  ;;  %v3627_v32 = vsub.f32 %v6059_v21, %v6068_v23 }
 0x527   :  { %v5160_v31 = vpop.f32.mrf.mxu1 }
 0x528   :  { %v2921_v29 = vsel %vm60_vm0, %v2894_v27, 0  ;;  %v6080_v27 = vand.u32 4294901760, %v6071_v25  ;;  %v6083_v31 = vsub.f32 %v3489_v22, %v6073_v17 }
 0x529   :  { %v3002_v37 = vand.u32 4294901760, %v2921_v29 }
 0x52b   :  { %v3003_v44 = vsub.f32 %v2921_v29, %v3002_v37  ;;  %5181 = vmatmul.mubr.f32.vlgmr.msra.gmra.mxu1 %v3002_v37  ;;  %v3628_v29 = vand.u32 4294901760, %v3627_v32 }
 0x52c   :  { %5195 = vmatpush3.msra.mxu1 %v5952_v28  ;;  %5202 = vmatprep.mubr.f32.mxu1 %v2994_v1  ;;  %v3492_v1 = vld [vmem:[#allocation5 + $0x50] sm:$0xff] }
 0x52d   :  { %5196 = vmatprep.subr.mxu1 %v5956_v34  ;;  %v3004_v48 = vand.u32 4294901760, %v3003_v44  ;;  %v6045_v14 = vand.u32 4294901760, %v3492_v1 }
 0x52e   :  { %5197 = vmatpush3.msra.mxu1 %v5956_v34 }
 0x52f   :  { %5198 = vmatprep.subr.mxu1 %v5961_v36  ;;  %v3005_v52 = vsub.f32 %v3003_v44, %v3004_v48  ;;  %v6048_v20 = vsub.f32 %v3492_v1, %v6045_v14 }
 0x530   :  { %5199 = vmatpush3.msra.mxu1 %v5961_v36 }
 0x531   :  { %5200 = vmatprep.subr.mxu1 %v5968_v39  ;;  %v3006_v49 = vand.u32 4294901760, %v3005_v52  ;;  %v6056_v19 = vand.u32 4294901760, %v6048_v20 }
 0x532   :  { %5201 = vmatpush3.msra.mxu1 %v5968_v39 }
 0x533   :  { %5203 = vmatmul.mubr.f32.vlgmr.msra.gmra.mxu1 %v3004_v48  ;;  %5216 = vmatprep.subr.mxu1 %v5952_v28  ;;  %v3620_v50 = vsub.f32 %v6048_v20, %v6056_v19 }
 0x534   :  { %5170 = vmatmul.mubr.f32.vlgmr.msra.gmra.mxu0 %v3006_v49  ;;  %5217 = vmatpush3.msra.mxu1 %v5952_v28 }
 0x535   :  { %5184 = vmatpush3.msra.mxu0 %v5959_v35  ;;  %5224 = vmatprep.mubr.f32.mxu1 %v2992_v5  ;;  %v3621_v26 = vand.u32 4294901760, %v3620_v50 }
 0x536   :  { %5185 = vmatprep.subr.mxu0 %v5965_v43  ;;  %5191 = vmatprep.mubr.f32.mxu0 %v2993_v9 }
 0x537   :  { %5218 = vmatprep.subr.mxu1 %v5956_v34  ;;  %5186 = vmatpush3.msra.mxu0 %v5965_v43 }
 0x538   :  { %5219 = vmatpush3.msra.mxu1 %v5956_v34  ;;  %5187 = vmatprep.subr.mxu0 %v5972_v40  ;;  %v2915_v34 = vpop.permute.xlu1 %2914 }
 0x539   :  { %5220 = vmatprep.subr.mxu1 %v5961_v36  ;;  %5188 = vmatpush3.msra.mxu0 %v5972_v40 }
 0x53a   :  { %5221 = vmatpush3.msra.mxu1 %v5961_v36  ;;  %5189 = vmatprep.subr.mxu0 %v5980_v42 }
 0x53b   :  { %5222 = vmatprep.subr.mxu1 %v5968_v39  ;;  %5190 = vmatpush3.msra.mxu0 %v5980_v42 }
 0x53c   :  { %5223 = vmatpush3.msra.mxu1 %v5968_v39  ;;  %5192 = vmatmul.mubr.f32.vlgmr.msra.gmra.mxu0 %v3003_v44  ;;  %v6090_v44 = vand.u32 4294901760, %v6083_v31 }
 0x53d   :  { %5205 = vmatprep.subr.mxu0 %v5975_v41  ;;  %5225 = vmatmul.mubr.f32.vlgmr.msra.gmra.mxu1 %v3002_v37 }
 0x53e   :  { %5206 = vmatpush3.msra.mxu0 %v5975_v41  ;;  %5213 = vmatprep.mubr.f32.mxu0 %v2992_v5  ;;  %v3641_v52 = vsub.f32 %v6083_v31, %v6090_v44 }
 0x53f   :  { %5207 = vmatprep.subr.mxu0 %v5985_v45  ;;  %5238 = vmatprep.subr.mxu1 %v3621_v26 }
 0x540   :  { %5208 = vmatpush3.msra.mxu0 %v5985_v45  ;;  %5239 = vmatpush3.msra.mxu1 %v3621_v26  ;;  %v3642_v49 = vand.u32 4294901760, %v3641_v52 }
 0x541   :  { %5209 = vmatprep.subr.mxu0 %v5992_v53  ;;  %5240 = vmatprep.subr.mxu1 %v3628_v29 }
 0x542   :  { %5210 = vmatpush3.msra.mxu0 %v5992_v53  ;;  %5241 = vmatpush3.msra.mxu1 %v3628_v29 }
 0x543   :  { %5211 = vmatprep.subr.mxu0 %v5997_v56 }
 0x544   :  { %5212 = vmatpush3.msra.mxu0 %v5997_v56 }
 0x545   :  { %5214 = vmatmul.mubr.f32.vlgmr.msra.gmra.mxu0 %v3002_v37  ;;  %5227 = vmatprep.subr.mxu0 %v6045_v14  ;;  %v3634_v37 = vsub.f32 %v6071_v25, %v6080_v27 }
 0x546   :  { %5228 = vmatpush3.msra.mxu0 %v6045_v14 }
 0x547   :  { %5229 = vmatprep.subr.mxu0 %v6050_v16  ;;  %v3635_v48 = vand.u32 4294901760, %v3634_v37 }
 0x548   :  { %5230 = vmatpush3.msra.mxu0 %v6050_v16 }
 0x549   :  { %5231 = vmatprep.subr.mxu0 %v6061_v3  ;;  %5242 = vmatprep.subr.mxu1 %v3635_v48 }
 0x54a   :  { %5232 = vmatpush3.msra.mxu0 %v6061_v3  ;;  %5243 = vmatpush3.msra.mxu1 %v3635_v48 }
 0x54b   :  { %5233 = vmatprep.subr.mxu0 %v6073_v17  ;;  %5244 = vmatprep.subr.mxu1 %v3642_v49 }
 0x54c   :  { %5234 = vmatpush3.msra.mxu0 %v6073_v17  ;;  %5245 = vmatpush3.msra.mxu1 %v3642_v49 }
 0x54d   :  { %5249 = vmatprep.subr.mxu0 %v6048_v20  ;;  %5260 = vmatprep.subr.mxu1 %v6045_v14 }
 0x5eb   :  { %v5182_v35 = vpop.f32.mrf.mxu1 }
 0x5ed   :  { %v3099_v41 = vpop.f32.mrf.mxu1 }
 0x5f3   :  { %v5204_v54 = vpop.f32.mrf.mxu1 }
 0x5f4   :  { %v5171_v28 = vpop.f32.mrf.mxu0 }
 0x5f5   :  { %v3009_v43 = vadd.f32 %v5171_v28, %v2915_v34  ;;  %v3269_v53 = vpop.f32.mrf.mxu1 }
 0x5f6   :  { %v2998_v36 = vpop.f32.mrf.mxu0 }
 0x5f7   :  { %v2999_v39 = vadd.f32 %v2998_v36, %v2915_v34  ;;  %v3106_v42 = vadd.f32 %v5182_v35, %v3009_v43 }
 0x5f9   :  { %v3100_v58 = vadd.f32 %v3099_v41, %v2999_v39 }
 0x5fc   :  { %v5193_v40 = vpop.f32.mrf.mxu0 }
 0x5fd   :  { %v3193_v57 = vadd.f32 %v5193_v40, %v3106_v42  ;;  %v5226_v61 = vpop.f32.mrf.mxu1 }
 0x5fe   :  { %v3185_v45 = vpop.f32.mrf.mxu0 }
 0x5ff   :  { %v3186_v59 = vadd.f32 %v3185_v45, %v3100_v58  ;;  %v3278_v60 = vadd.f32 %v5204_v54, %v3193_v57  ;;  %v3441_v6 = vpop.f32.mrf.mxu1 }
 0x601   :  { %v3270_v24 = vadd.f32 %v3269_v53, %v3186_v59 }
 0x605   :  { %v5215_v63 = vpop.f32.mrf.mxu0 }
 0x606   :  { %v3367_v56 = vadd.f32 %v5215_v63, %v3278_v60 }
 0x607   :  { %v3360_v30 = vpop.f32.mrf.mxu0 }
 0x608   :  { %v3448_v0 = vadd.f32 %v5226_v61, %v3367_v56  ;;  %v3361_v4 = vadd.f32 %v3360_v30, %v3270_v24 }
 0x60a   :  { %v3442_v11 = vadd.f32 %v3441_v6, %v3361_v4  ;;  %v3452_v12 = vadd.f32 %v3448_v0, %v5596_v55 }
 0x60c   :  { %v3456_v10 = vsel %vm60_vm0, %v3452_v12, 0.0  ;;  %v3451_v13 = vadd.f32 %v3442_v11, %v5591_v51 }
 0x60d   :  { %3457 = vadd.xlane.f32.xlu1 %v3456_v10 }
 0x60e   :  { %v3453_v2 = vsel %vm60_vm0, %v3451_v13, 0.0 }
 0x60f   :  { %3454 = vadd.xlane.f32.xlu0 %v3453_v2  ;;  %v4044_v2 = vld [vmem:[#allocation5 + $0x58] sm:$0xff] }
 0x61e   :  { %3484 = vrot.lane.b32.xlu1 %v5384_v33, %s5482_s30 }
 0x696   :  { %v3458_v8 = vpop.xlane.xlu1 %3457 }
 0x697   :  { %v3460_v18 = vmul.f32 0.03125, %v3458_v8 }
 0x698   :  { %v3455_v47 = vpop.xlane.xlu0 %3454 }
 0x699   :  { %v3459_v38 = vmul.f32 0.03125, %v3455_v47  ;;  %v6039_v7 = vsub.f32 %v3452_v12, %v3460_v18  ;;  %v4043_v18 = vld [vmem:[#allocation5 + $0x40] sm:$0xff] }
 0x69a   :  { %v3485_v54 = vpop.permute.xlu1 %3484 }
 0x69b   :  { %v3461_v15 = vsub.f32 %v3451_v13, %v3459_v38  ;;  %v3464_v51 = vmul.f32 %v6039_v7, %v6039_v7  ;;  %v6145_v38 = vand.u32 4294901760, %v4043_v18 }
 0x69d   :  { %v3463_v5 = vmul.f32 %v3461_v15, %v3461_v15  ;;  %v3468_v9 = vsel %vm60_vm0, %v3464_v51, 0.0 }
 0x69f   :  { %v3465_v55 = vsel %vm60_vm0, %v3463_v5, 0.0  ;;  %v4042_v5 = vld [vmem:[#allocation5 + $0x28] sm:$0xff] }
 0x6a0   :  { %3466 = vadd.xlane.f32.xlu0 %v3465_v55 }
 0x6a4   :  { %3469 = vadd.xlane.f32.xlu0 %v3468_v9  ;;  %v6157_v9 = vand.u32 4294901760, %v4042_v5 }
 0x6ba   :  { %3479 = vrot.lane.b32.xlu0 %v5384_v33, %s5479_s2  ;;  %v6135_v33 = vand.u32 4294901760, %v4044_v2 }
 0x6bc   :  { %v6138_v8 = vsub.f32 %v4044_v2, %v6135_v33 }
 0x6be   :  { %v6143_v47 = vand.u32 4294901760, %v6138_v8 }
 0x729   :  { %v3467_v28 = vpop.xlane.xlu0 %3466 }
 0x72a   :  { %v3471_v34 = vmul.f32 0.03125, %v3467_v28 }
 0x72c   :  { %v3473_v35 = vadd.f32 0.001, %v3471_v34 }
 0x72d   :  { %v3470_v36 = vpop.xlane.xlu0 %3469 }
 0x72e   :  { %5376 = vrsqrt.f32 %v3473_v35  ;;  %v3472_v43 = vmul.f32 0.03125, %v3470_v36 }
 0x730   :  { %v3474_v39 = vadd.f32 0.001, %v3472_v43 }
 0x731   :  { %v3480_v41 = vpop.permute.xlu0 %3479 }
 0x732   :  { %5378 = vrsqrt.f32 %v3474_v39 }
 0x73b   :  { %v5377_v40 = vpop.eup %5376 }
 0x73c   :  { %v3477_v42 = vmul.f32 %v5377_v40, %v3461_v15  ;;  %v6150_v15 = vsub.f32 %v4043_v18, %v6145_v38 }
 0x73e   :  { %v3482_v45 = vmul.f32 %v3480_v41, %v3477_v42  ;;  %v6155_v51 = vand.u32 4294901760, %v6150_v15 }
 0x73f   :  { %v5379_v57 = vpop.eup %5378 }
 0x740   :  { %v3478_v58 = vmul.f32 %v5379_v57, %v6039_v7  ;;  %v6097_v59 = vadd.f32 %v3485_v54, %v3482_v45  ;;  %v4166_v7 = vsub.f32 %v6138_v8, %v6143_v47  ;;  %v4173_v1 = vsub.f32 %v6150_v15, %v6155_v51 }
 0x742   :  { %v3483_v53 = vmul.f32 %v3480_v41, %v3478_v58  ;;  %v3498_v60 = vsel %vm60_vm0, %v6097_v59, 0  ;;  %v4167_v55 = vand.u32 4294901760, %v4166_v7 }
 0x743   :  { %v3572_v61 = vand.u32 4294901760, %v3498_v60 }
 0x744   :  { %v6101_v63 = vadd.f32 %v3485_v54, %v3483_v53 }
 0x745   :  { %v3573_v56 = vsub.f32 %v3498_v60, %v3572_v61  ;;  %5246 = vmatprep.mubr.f32.mxu1 %v3572_v61 }
 0x746   :  { %v3501_v24 = vsel %vm60_vm0, %v6101_v63, 0 }
 0x747   :  { %v3582_v30 = vand.u32 4294901760, %v3501_v24  ;;  %v3574_v0 = vand.u32 4294901760, %v3573_v56 }
 0x749   :  { %v3583_v4 = vsub.f32 %v3501_v24, %v3582_v30  ;;  %5247 = vmatmul.mubr.f32.vlgmr.msra.gmra.mxu1 %v3582_v30  ;;  %v3575_v6 = vsub.f32 %v3573_v56, %v3574_v0 }
 0x74a   :  { %5261 = vmatpush3.msra.mxu1 %v6045_v14  ;;  %5268 = vmatprep.mubr.f32.mxu1 %v3574_v0 }
 0x74b   :  { %5262 = vmatprep.subr.mxu1 %v6050_v16  ;;  %v3576_v11 = vand.u32 4294901760, %v3575_v6  ;;  %v3584_v12 = vand.u32 4294901760, %v3583_v4 }
 0x74c   :  { %5263 = vmatpush3.msra.mxu1 %v6050_v16 }
 0x74d   :  { %5264 = vmatprep.subr.mxu1 %v6061_v3  ;;  %5235 = vmatprep.mubr.f32.mxu0 %v3576_v11  ;;  %v3585_v10 = vsub.f32 %v3583_v4, %v3584_v12 }
 0x74e   :  { %5265 = vmatpush3.msra.mxu1 %v6061_v3 }
 0x74f   :  { %5266 = vmatprep.subr.mxu1 %v6073_v17  ;;  %v3586_v13 = vand.u32 4294901760, %v3585_v10 }
 0x750   :  { %5267 = vmatpush3.msra.mxu1 %v6073_v17 }
 0x751   :  { %5269 = vmatmul.mubr.f32.vlgmr.msra.gmra.mxu1 %v3584_v12  ;;  %5282 = vmatprep.subr.mxu1 %v6045_v14 }
 0x752   :  { %5236 = vmatmul.mubr.f32.vlgmr.msra.gmra.mxu0 %v3586_v13  ;;  %5283 = vmatpush3.msra.mxu1 %v6045_v14  ;;  %v6162_v14 = vsub.f32 %v4042_v5, %v6157_v9 }
 0x753   :  { %5250 = vmatpush3.msra.mxu0 %v6048_v20  ;;  %5290 = vmatprep.mubr.f32.mxu1 %v3572_v61  ;;  %v4174_v20 = vand.u32 4294901760, %v4173_v1 }
 0x754   :  { %5251 = vmatprep.subr.mxu0 %v6059_v21  ;;  %5257 = vmatprep.mubr.f32.mxu0 %v3573_v56 }
 0x755   :  { %5284 = vmatprep.subr.mxu1 %v6050_v16  ;;  %5252 = vmatpush3.msra.mxu0 %v6059_v21  ;;  %v6174_v21 = vsub.f32 %v4041_v46, %v6169_v62 }
 0x756   :  { %5285 = vmatpush3.msra.mxu1 %v6050_v16  ;;  %5253 = vmatprep.subr.mxu0 %v6071_v25  ;;  %v6167_v16 = vand.u32 4294901760, %v6162_v14 }
 0x757   :  { %5286 = vmatprep.subr.mxu1 %v6061_v3  ;;  %5254 = vmatpush3.msra.mxu0 %v6071_v25  ;;  %v6179_v22 = vand.u32 4294901760, %v6174_v21 }
 0x758   :  { %5287 = vmatpush3.msra.mxu1 %v6061_v3  ;;  %5255 = vmatprep.subr.mxu0 %v6083_v31 }
 0x759   :  { %5288 = vmatprep.subr.mxu1 %v6073_v17  ;;  %5256 = vmatpush3.msra.mxu0 %v6083_v31  ;;  %v4187_v50 = vsub.f32 %v6174_v21, %v6179_v22 }
 0x75a   :  { %5289 = vmatpush3.msra.mxu1 %v6073_v17  ;;  %5258 = vmatmul.mubr.f32.vlgmr.msra.gmra.mxu0 %v3583_v4  ;;  %v4601_v17 = vld [vmem:[#allocation7 + $0x2] ss:$0 sm:$0xff] }
 0x75b   :  { %5271 = vmatprep.subr.mxu0 %v6056_v19  ;;  %5291 = vmatmul.mubr.f32.vlgmr.msra.gmra.mxu1 %v3582_v30 }
 0x75c   :  { %5272 = vmatpush3.msra.mxu0 %v6056_v19  ;;  %5279 = vmatprep.mubr.f32.mxu0 %v3572_v61  ;;  %v4180_v19 = vsub.f32 %v6162_v14, %v6167_v16 }
 0x75d   :  { %5273 = vmatprep.subr.mxu0 %v6068_v23  ;;  %5304 = vmatprep.subr.mxu1 %v4167_v55 }
 0x75e   :  { %5274 = vmatpush3.msra.mxu0 %v6068_v23  ;;  %5305 = vmatpush3.xpose.msra.mxu1 %v4167_v55  ;;  %v4181_v3 = vand.u32 4294901760, %v4180_v19  ;;  %v4188_v23 = vand.u32 4294901760, %v4187_v50 }
 0x75f   :  { %5275 = vmatprep.subr.mxu0 %v6080_v27  ;;  %5306 = vmatprep.subr.mxu1 %v4174_v20 }
 0x760   :  { %5276 = vmatpush3.msra.mxu0 %v6080_v27 }
 0x761   :  { %5277 = vmatprep.subr.mxu0 %v6090_v44 }
 0x762   :  { %5278 = vmatpush3.msra.mxu0 %v6090_v44  ;;  %5307 = vmatpush3.xpose.msra.mxu1 %v4174_v20 }
 0x763   :  { %5280 = vmatmul.mubr.f32.vlgmr.msra.gmra.mxu0 %v3582_v30  ;;  %5293 = vmatprep.subr.mxu0 %v6135_v33 }
 0x764   :  { %5294 = vmatpush3.xpose.msra.mxu0 %v6135_v33  ;;  %5308 = vmatprep.subr.mxu1 %v4181_v3 }
 0x765   :  { %5295 = vmatprep.subr.mxu0 %v6145_v38 }
 0x766   :  { %5309 = vmatpush3.xpose.msra.mxu1 %v4181_v3 }
 0x767   :  { %5310 = vmatprep.subr.mxu1 %v4188_v23 }
 0x768   :  { %5296 = vmatpush3.xpose.msra.mxu0 %v6145_v38 }
 0x769   :  { %5297 = vmatprep.subr.mxu0 %v6157_v9 }
 0x76a   :  { %5311 = vmatpush3.xpose.msra.mxu1 %v4188_v23 }
 0x76b   :  { %5326 = vmatprep.subr.mxu1 %v6135_v33 }
 0x76c   :  { %5298 = vmatpush3.xpose.msra.mxu0 %v6157_v9 }
 0x76d   :  { %5299 = vmatprep.subr.mxu0 %v6169_v62 }
 0x770   :  { %5300 = vmatpush3.xpose.msra.mxu0 %v6169_v62 }
 0x771   :  { %5315 = vmatprep.subr.mxu0 %v6138_v8 }
 0x809   :  { %v5248_v26 = vpop.f32.mrf.mxu1 }
 0x80b   :  { %v3679_v37 = vpop.f32.mrf.mxu1 }
 0x811   :  { %v5270_v48 = vpop.f32.mrf.mxu1 }
 0x812   :  { %v5237_v25 = vpop.f32.mrf.mxu0 }
 0x813   :  { %v3589_v27 = vadd.f32 %v5237_v25, %v4601_v17  ;;  %v3849_v35 = vpop.f32.mrf.mxu1 }
 0x814   :  { %v3578_v32 = vpop.f32.mrf.mxu0 }
 0x815   :  { %v3579_v31 = vadd.f32 %v4601_v17, %v3578_v32  ;;  %v3686_v44 = vadd.f32 %v5248_v26, %v3589_v27 }
 0x817   :  { %v3680_v28 = vadd.f32 %v3679_v37, %v3579_v31 }
 0x81a   :  { %v5259_v29 = vpop.f32.mrf.mxu0 }
 0x81b   :  { %v3773_v49 = vadd.f32 %v5259_v29, %v3686_v44  ;;  %v5292_v43 = vpop.f32.mrf.mxu1 }
 0x81c   :  { %v3765_v52 = vpop.f32.mrf.mxu0 }
 0x81d   :  { %v3766_v34 = vadd.f32 %v3765_v52, %v3680_v28  ;;  %v3858_v36 = vadd.f32 %v5270_v48, %v3773_v49  ;;  %v4021_v57 = vpop.f32.mrf.mxu1 }
 0x81f   :  { %v3850_v41 = vadd.f32 %v3849_v35, %v3766_v34 }
 0x823   :  { %v5281_v39 = vpop.f32.mrf.mxu0 }
 0x824   :  { %v3947_v40 = vadd.f32 %v5281_v39, %v3858_v36 }
 0x825   :  { %v3940_v42 = vpop.f32.mrf.mxu0 }
 0x826   :  { %v4028_v54 = vadd.f32 %v5292_v43, %v3947_v40  ;;  %v3941_v45 = vadd.f32 %v3940_v42, %v3850_v41 }
 0x828   :  { %v4034_v58 = vmul.f32 0.70710677, %v4028_v54  ;;  %v4022_v53 = vadd.f32 %v4021_v57, %v3941_v45  ;;  %v4032_v56 = vmul.f32 0.5, %v4028_v54 }
 0x82a   :  { %5380 = verf.f32 %v4034_v58  ;;  %v4033_v60 = vmul.f32 0.70710677, %v4022_v53  ;;  %v4031_v4 = vmul.f32 0.5, %v4022_v53 }
 0x82c   :  { %5382 = verf.f32 %v4033_v60 }
 0x837   :  { %v5381_v61 = vpop.eup %5380 }
 0x838   :  { %v4038_v24 = vadd.f32 1.0, %v5381_v61 }
 0x839   :  { %v5383_v30 = vpop.eup %5382 }
 0x83a   :  { %v4040_v0 = vmul.f32 %v4038_v24, %v4032_v56  ;;  %v4037_v6 = vadd.f32 1.0, %v5383_v30 }
 0x83c   :  { %v4039_v11 = vmul.f32 %v4037_v6, %v4031_v4  ;;  %v4128_v12 = vand.u32 4294901760, %v4040_v0 }
 0x83e   :  { %v4118_v10 = vand.u32 4294901760, %v4039_v11  ;;  %v4129_v13 = vsub.f32 %v4040_v0, %v4128_v12 }
 0x840   :  { %5312 = vmatprep.mubr.f32.mxu1 %v4118_v10  ;;  %v4119_v2 = vsub.f32 %v4039_v11, %v4118_v10  ;;  %v4130_v18 = vand.u32 4294901760, %v4129_v13 }
 0x841   :  { %5313 = vmatmul.mubr.f32.vlgmr.msra.gmra.mxu1 %v4128_v12 }
 0x842   :  { %5327 = vmatpush3.xpose.msra.mxu1 %v6135_v33  ;;  %v4120_v7 = vand.u32 4294901760, %v4119_v2  ;;  %v4131_v5 = vsub.f32 %v4129_v13, %v4130_v18 }
 0x843   :  { %5328 = vmatprep.subr.mxu1 %v6145_v38 }
 0x844   :  { %5334 = vmatprep.mubr.f32.mxu1 %v4120_v7  ;;  %v4121_v55 = vsub.f32 %v4119_v2, %v4120_v7  ;;  %v4132_v46 = vand.u32 4294901760, %v4131_v5 }
 0x846   :  { %5329 = vmatpush3.xpose.msra.mxu1 %v6145_v38  ;;  %v4122_v1 = vand.u32 4294901760, %v4121_v55 }
 0x847   :  { %5330 = vmatprep.subr.mxu1 %v6157_v9 }
 0x848   :  { %5301 = vmatprep.mubr.f32.mxu0 %v4122_v1 }
 0x849   :  { %5302 = vmatmul.mubr.f32.vlgmr.msra.gmra.mxu0 %v4132_v46 }
 0x84a   :  { %5316 = vmatpush3.xpose.msra.mxu0 %v6138_v8  ;;  %5331 = vmatpush3.xpose.msra.mxu1 %v6157_v9  ;;  %v4602_v8 = vld [vmem:[#allocation7 + $0x3] ss:$0 sm:$0xff] }
 0x84b   :  { %5323 = vmatprep.mubr.f32.mxu0 %v4119_v2  ;;  %5317 = vmatprep.subr.mxu0 %v6150_v15 }
 0x84c   :  { %5332 = vmatprep.subr.mxu1 %v6169_v62 }
 0x84e   :  { %5318 = vmatpush3.xpose.msra.mxu0 %v6150_v15  ;;  %5333 = vmatpush3.xpose.msra.mxu1 %v6169_v62 }
 0x84f   :  { %5319 = vmatprep.subr.mxu0 %v6162_v14  ;;  %5348 = vmatprep.subr.mxu1 %v6135_v33 }
 0x851   :  { %5335 = vmatmul.mubr.f32.vlgmr.msra.gmra.mxu1 %v4130_v18 }
 0x852   :  { %5320 = vmatpush3.xpose.msra.mxu0 %v6162_v14  ;;  %5349 = vmatpush3.xpose.msra.mxu1 %v6135_v33 }
 0x853   :  { %5356 = vmatprep.mubr.f32.mxu1 %v4118_v10  ;;  %5321 = vmatprep.subr.mxu0 %v6174_v21 }
 0x854   :  { %5350 = vmatprep.subr.mxu1 %v6145_v38 }
 0x856   :  { %5322 = vmatpush3.xpose.msra.mxu0 %v6174_v21  ;;  %5351 = vmatpush3.xpose.msra.mxu1 %v6145_v38 }
 0x857   :  { %5337 = vmatprep.subr.mxu0 %v6143_v47  ;;  %5352 = vmatprep.subr.mxu1 %v6157_v9 }
 0x859   :  { %5324 = vmatmul.mubr.f32.vlgmr.msra.gmra.mxu0 %v4129_v13 }
 0x85a   :  { %5338 = vmatpush3.xpose.msra.mxu0 %v6143_v47  ;;  %5345 = vmatprep.mubr.f32.mxu0 %v4118_v10 }
 0x85b   :  { %5353 = vmatpush3.xpose.msra.mxu1 %v6157_v9  ;;  %5339 = vmatprep.subr.mxu0 %v6155_v51 }
 0x85c   :  { %5354 = vmatprep.subr.mxu1 %v6169_v62 }
 0x85e   :  { %5340 = vmatpush3.xpose.msra.mxu0 %v6155_v51 }
 0x85f   :  { %5355 = vmatpush3.xpose.msra.mxu1 %v6169_v62  ;;  %5341 = vmatprep.subr.mxu0 %v6167_v16 }
 0x862   :  { %5357 = vmatmul.mubr.f32.vlgmr.msra.gmra.mxu1 %v4128_v12  ;;  %5342 = vmatpush3.xpose.msra.mxu0 %v6167_v16 }
 0x863   :  { %5343 = vmatprep.subr.mxu0 %v6179_v22 }
 0x866   :  { %5344 = vmatpush3.xpose.msra.mxu0 %v6179_v22 }
 0x869   :  { %5346 = vmatmul.mubr.f32.vlgmr.msra.gmra.mxu0 %v4128_v12 }
 0x901   :  { %v5314_v47 = vpop.f32.mrf.mxu1 }
 0x903   :  { %v4225_v51 = vpop.f32.mrf.mxu1 }
 0x909   :  { %v5303_v33 = vpop.f32.mrf.mxu0 }
 0x90a   :  { %v4135_v15 = vadd.f32 %v5303_v33, %v4602_v8 }
 0x90b   :  { %v4124_v38 = vpop.f32.mrf.mxu0 }
 0x90c   :  { %v4125_v14 = vadd.f32 %v4602_v8, %v4124_v38  ;;  %v4232_v20 = vadd.f32 %v5314_v47, %v4135_v15 }
 0x90e   :  { %v4226_v3 = vadd.f32 %v4225_v51, %v4125_v14 }
 0x911   :  { %v5336_v62 = vpop.f32.mrf.mxu1 }
 0x913   :  { %v4395_v16 = vpop.f32.mrf.mxu1 }
 0x919   :  { %v5325_v9 = vpop.f32.mrf.mxu0 }
 0x91a   :  { %v4319_v21 = vadd.f32 %v5325_v9, %v4232_v20 }
 0x91b   :  { %v4311_v19 = vpop.f32.mrf.mxu0 }
 0x91c   :  { %v4312_v50 = vadd.f32 %v4311_v19, %v4226_v3  ;;  %v4404_v23 = vadd.f32 %v5336_v62, %v4319_v21 }
 0x91e   :  { %v4396_v26 = vadd.f32 %v4395_v16, %v4312_v50 }
 0x922   :  { %v5358_v25 = vpop.f32.mrf.mxu1 }
 0x924   :  { %v4567_v29 = vpop.f32.mrf.mxu1 }
 0x929   :  { %v5347_v17 = vpop.f32.mrf.mxu0 }
 0x92a   :  { %v4493_v22 = vadd.f32 %v5347_v17, %v4404_v23 }
 0x92b   :  { %v4486_v32 = vpop.f32.mrf.mxu0 }
 0x92c   :  { %v4574_v27 = vadd.f32 %v5358_v25, %v4493_v22  ;;  %v4487_v31 = vadd.f32 %v4486_v32, %v4396_v26 }
 0x92e   :  { %v4578_v37 = vadd.f32 %v4574_v27, %v6101_v63  ;;  %v4568_v44 = vadd.f32 %v4567_v29, %v4487_v31 }
 0x930   :  { %4580 = vst.msk [vmem:[#allocation8 + $0x8] sm:$0xff] %vm60_vm0, %v4578_v37  ;;  %v4577_v48 = vadd.f32 %v4568_v44, %v6097_v59 }
 0x932   :  { %4579 = vst.msk [vmem:[#allocation8] sm:$0xff] %vm60_vm0, %v4577_v48 }
 0x933   :  { %5456 = shalt.err (!%p5453_p5)
}
 0x934   :  { %4592 = dma.vmem_to_hbm [thread:$0]  %s4587_s5, 256, %s6228_s3, [#allocation4], %s5475_s22, %s5475_s22, %s5476_s23  }
 0x935   :  { %5469 = dma.done.wait [#allocation4], 256  }
 0x936   :  { %5470 = vsyncadd [#allocation4], 4294967040 }
 0x937   :  { %4596 = vsyncpa [#allocation3], 1 }
 0x938   :  { %4597 = vsyncpa [#allocation6], 1 }
 0x939   :  { %4598 = vsyncpa [#allocation4], 1 }

</bundles_post_ra>
